<compile_context>
chip_gen: v6e
topology: v6e:2x2x1
jax: 0.10.0
libtpu: 0.0.40
codegen_flags: <defaults>
</compile_context>

<pallas_src>
import functools

import jax
import jax.numpy as jnp
from jax.experimental import pallas as pl

KPAD = 128   # zero-padded im2col contraction dim (C*9 = 36 -> 128)
FPAD = 128   # zero-padded backbone feature dim   (32     -> 128)


# ----------------------------------------------------------------------------
# Pallas kernels
# ----------------------------------------------------------------------------
def moco_encoder_kernel(p_ref, wc_ref, bc_ref, pool_ref, wp_ref, bp_ref, o_ref):
    """Fused backbone + projector + L2 normalize for the whole batch.

    p_ref   : (N*H*W, KPAD) bf16  im2col patches (zero-padded on K)
    wc_ref  : (KPAD, FPAD)  bf16  conv weight in im2col layout (zero-padded)
    bc_ref  : (1, FPAD)     f32   conv bias (zero-padded)
    pool_ref: (N, N*H*W)    f32   block mean-pool matrix (entries 1/(H*W))
    wp_ref  : (FPAD, P)     bf16  projector weight (zero-padded rows)
    bp_ref  : (1, P)        f32   projector bias
    o_ref   : (N, P)        f32   L2-normalized embeddings
    """
    # Conv as one big MXU matmul (bf16 inputs, f32 accumulation) + bias + ReLU.
    conv = jnp.dot(p_ref[...], wc_ref[...],
                   preferred_element_type=jnp.float32)            # (N*HW, FPAD)
    conv = jnp.maximum(conv + bc_ref[...], 0.0)
    # Global average pool over spatial positions, expressed as a matmul so no
    # in-kernel reshape is required.
    feat = jnp.dot(pool_ref[...], conv,
                   preferred_element_type=jnp.float32)            # (N, FPAD)
    # Projector.
    proj = jnp.dot(feat.astype(jnp.bfloat16), wp_ref[...],
                   preferred_element_type=jnp.float32) + bp_ref[...]   # (N, P)
    # F.normalize(dim=1): x / max(||x||, 1e-12) == x * rsqrt(max(sq, 1e-24)).
    sq = jnp.sum(proj * proj, axis=-1, keepdims=True)
    o_ref[...] = proj * jax.lax.rsqrt(jnp.maximum(sq, 1e-24))


def _momentum_kernel(m):
    def kern(wcq, bcq, wpq, bpq, wck, bck, wpk, bpk, wco, bco, wpo, bpo):
        for q, k, o in ((wcq, wck, wco), (bcq, bck, bco),
                        (wpq, wpk, wpo), (bpq, bpk, bpo)):
            o[...] = k[...] * m + q[...] * (1.0 - m)
    return kern


# ----------------------------------------------------------------------------
# Wrappers
# ----------------------------------------------------------------------------
def encode(patches, params, n_batch):
    """patches: (N*H*W, KPAD) bf16 -> (N, P) f32 normalized embeddings."""
    wc, bc, wp, bp = params
    nhw = patches.shape[0]
    hw = nhw // n_batch
    proj_dim = wp.shape[1]
    # pool[n, n*HW + s] = 1/HW  (block structure of the global average pool)
    pool = jnp.repeat(jnp.eye(n_batch, dtype=jnp.float32), hw, axis=1) * (1.0 / hw)
    return pl.pallas_call(
        moco_encoder_kernel,
        out_shape=jax.ShapeDtypeStruct((n_batch, proj_dim), jnp.float32),
    )(patches, wc.astype(jnp.bfloat16), bc, pool, wp.astype(jnp.bfloat16), bp)


def momentum_update(params_q, params_k, momentum):
    """param_k <- m*param_k + (1-m)*param_q; all four params in one fused
    pallas_call, with the param_k inputs aliased to the outputs (in-place)."""
    n_q = len(params_q)
    out_shape = tuple(jax.ShapeDtypeStruct(p.shape, p.dtype) for p in params_k)
    new_k = pl.pallas_call(
        _momentum_kernel(momentum),
        out_shape=out_shape,
        input_output_aliases={n_q + i: i for i in range(len(params_k))},
    )(*params_q, *params_k)
    return tuple(new_k)


def im2col_3x3(x_nchw):
    """NCHW -> (N*H*W, C*9) f32 patches; 3x3 kernel, stride 1, padding 1."""
    N, C, H, W = x_nchw.shape
    xp = jnp.pad(x_nchw, ((0, 0), (0, 0), (1, 1), (1, 1)))
    cols = [xp[:, :, dy:dy + H, dx:dx + W] for dy in range(3) for dx in range(3)]
    patches = jnp.stack(cols, axis=2)                          # (N, C, 9, H, W)
    return patches.transpose(0, 3, 4, 1, 2).reshape(N * H * W, C * 9)


def build_patches(x_nchw):
    """Lane-dense kernel input: zero-pad K up to KPAD and cast to bf16."""
    p = im2col_3x3(x_nchw)
    p = jnp.pad(p, ((0, 0), (0, KPAD - p.shape[1])))
    return p.astype(jnp.bfloat16)


@functools.partial(jax.jit, static_argnames=("momentum",))
def moco_forward(x_q, x_k, params_q, params_k, shuffle_key, momentum):
    """Replicates MoCo.forward; returns (q, k) and the updated key params."""
    n = x_q.shape[0]
    # --- query branch ---
    q = encode(build_patches(x_q), params_q, n)

    # --- key branch (torch.no_grad in the reference) ---
    params_k = momentum_update(params_q, params_k, momentum)
    # single-device batch shuffle / unshuffle
    idx_shuffle = jax.random.permutation(shuffle_key, n)
    idx_unshuffle = jnp.argsort(idx_shuffle)
    x_k_shuf = jnp.take(x_k, idx_shuffle, axis=0)
    k = encode(build_patches(x_k_shuf), params_k, n)
    k = jnp.take(k, idx_unshuffle, axis=0)
    return (q, k), params_k


# ----------------------------------------------------------------------------
# Pure-JAX reference (f32, unpadded) for numerical verification
# ----------------------------------------------------------------------------
def encode_ref(x_nchw, params, feat_dim, kdim):
    wc, bc, wp, bp = params
    n, c, h, w = x_nchw.shape
    p = im2col_3x3(x_nchw).reshape(n, h * w, kdim)
    conv = jnp.maximum(
        jnp.einsum("nsk,kf->nsf", p, wc[:kdim, :feat_dim]) + bc[:, :feat_dim], 0.0)
    feat = conv.mean(axis=1)
    proj = feat @ wp[:feat_dim, :] + bp
    nrm = jnp.maximum(jnp.linalg.norm(proj, axis=1, keepdims=True), 1e-12)
    return proj / nrm


# ----------------------------------------------------------------------------
if __name__ == "__main__":
    N, C, H, W = 2, 4, 16, 16
    FEAT, PROJ = 32, 128
    MOMENTUM = 0.999

    key = jax.random.PRNGKey(0)
    k1, k2, k3, k4, k5, k6, k7 = jax.random.split(key, 7)

    # encoder_q parameters, stored zero-padded to TPU-friendly shapes
    # (the padded regions are zero and stay zero under the momentum update).
    wc_q = jnp.zeros((KPAD, FPAD), jnp.float32).at[:C * 9, :FEAT].set(
        jax.random.normal(k1, (C * 9, FEAT), jnp.float32) * 0.1)
    bc_q = jnp.zeros((1, FPAD), jnp.float32).at[:, :FEAT].set(
        jax.random.normal(k2, (1, FEAT), jnp.float32) * 0.1)
    wp_q = jnp.zeros((FPAD, PROJ), jnp.float32).at[:FEAT, :].set(
        jax.random.normal(k3, (FEAT, PROJ), jnp.float32) * 0.1)
    bp_q = jax.random.normal(k4, (1, PROJ), jnp.float32) * 0.1
    params_q = (wc_q, bc_q, wp_q, bp_q)
    # encoder_k initialized as a copy of encoder_q (MoCo._init_encoder_k)
    params_k = jax.tree_util.tree_map(lambda p: p.copy(), params_q)

    x_q = jax.random.normal(k5, (N, C, H, W), jnp.float32)
    x_k = jax.random.normal(k6, (N, C, H, W), jnp.float32)

    (q, k_out), params_k_new = moco_forward(x_q, x_k, params_q, params_k,
                                            k7, momentum=MOMENTUM)
    (q, k_out), params_k_new = jax.block_until_ready(((q, k_out), params_k_new))

    # sanity: shapes + unit norms along dim=1
    assert q.shape == (N, PROJ) and k_out.shape == (N, PROJ)
    assert jnp.allclose(jnp.linalg.norm(q, axis=1), 1.0, atol=1e-4)
    assert jnp.allclose(jnp.linalg.norm(k_out, axis=1), 1.0, atol=1e-4)

    # numerical check vs pure-JAX f32 reference (bf16 MXU inputs -> loose tol)
    q_ref = encode_ref(x_q, params_q, FEAT, C * 9)
    k_ref = encode_ref(x_k, params_k_new, FEAT, C * 9)  # shuffle is a no-op
    assert jnp.allclose(q, q_ref, atol=2e-2)
    assert jnp.allclose(k_out, k_ref, atol=2e-2)
    # params_k == params_q initially, so the momentum update is the identity
    for p_new, p_q in zip(params_k_new, params_q):
        assert jnp.allclose(p_new, p_q, atol=1e-6)

    print("KERNEL_OK")
</pallas_src>

<mosaic_0001>
module attributes {stable_mosaic.version = 11 : i64} {
  func.func @moco_encoder_kernel(%arg0: memref<512x128xbf16, #tpu.memory_space<vmem>>, %arg1: memref<128x128xbf16, #tpu.memory_space<vmem>>, %arg2: memref<1x128xf32, #tpu.memory_space<vmem>>, %arg3: memref<2x512xf32, #tpu.memory_space<vmem>>, %arg4: memref<128x128xbf16, #tpu.memory_space<vmem>>, %arg5: memref<1x128xf32, #tpu.memory_space<vmem>>, %arg6: memref<2x128xf32, #tpu.memory_space<vmem>>) attributes {dimension_semantics = [], scalar_prefetch = 0 : i64, scratch_operands = 0 : i64, tpu.core_type = #tpu.core_type<tc>} {
    %c0 = arith.constant 0 : index
    %c0_0 = arith.constant 0 : index
    %0 = vector.load %arg0[%c0, %c0_0] : memref<512x128xbf16, #tpu.memory_space<vmem>>, vector<512x128xbf16>
    %c0_1 = arith.constant 0 : index
    %c0_2 = arith.constant 0 : index
    %1 = vector.load %arg1[%c0_1, %c0_2] : memref<128x128xbf16, #tpu.memory_space<vmem>>, vector<128x128xbf16>
    %cst = arith.constant dense<0.000000e+00> : vector<512x128xf32>
    %2 = tpu.matmul %0, %1, %cst {dimension_numbers = #tpu.dot_dimension_numbers<[1], [0], [0], [1], [0, 0, 1, 1], [], []>} : vector<512x128xbf16>, vector<128x128xbf16>, vector<512x128xf32> -> vector<512x128xf32>
    %c0_3 = arith.constant 0 : index
    %c0_4 = arith.constant 0 : index
    %3 = vector.load %arg2[%c0_3, %c0_4] : memref<1x128xf32, #tpu.memory_space<vmem>>, vector<1x128xf32>
    %4 = vector.broadcast %3 : vector<1x128xf32> to vector<512x128xf32>
    %5 = arith.addf %2, %4 : vector<512x128xf32>
    %cst_5 = arith.constant 0.000000e+00 : f32
    %6 = vector.broadcast %cst_5 : f32 to vector<512x128xf32>
    %7 = arith.maximumf %5, %6 : vector<512x128xf32>
    %c0_6 = arith.constant 0 : index
    %c0_7 = arith.constant 0 : index
    %8 = vector.load %arg3[%c0_6, %c0_7] : memref<2x512xf32, #tpu.memory_space<vmem>>, vector<2x512xf32>
    %cst_8 = arith.constant dense<0.000000e+00> : vector<2x128xf32>
    %9 = tpu.matmul %8, %7, %cst_8 {dimension_numbers = #tpu.dot_dimension_numbers<[1], [0], [0], [1], [0, 0, 1, 1], [], []>} : vector<2x512xf32>, vector<512x128xf32>, vector<2x128xf32> -> vector<2x128xf32>
    %10 = arith.truncf %9 : vector<2x128xf32> to vector<2x128xbf16>
    %c0_9 = arith.constant 0 : index
    %c0_10 = arith.constant 0 : index
    %11 = vector.load %arg4[%c0_9, %c0_10] : memref<128x128xbf16, #tpu.memory_space<vmem>>, vector<128x128xbf16>
    %cst_11 = arith.constant dense<0.000000e+00> : vector<2x128xf32>
    %12 = tpu.matmul %10, %11, %cst_11 {dimension_numbers = #tpu.dot_dimension_numbers<[1], [0], [0], [1], [0, 0, 1, 1], [], []>} : vector<2x128xbf16>, vector<128x128xbf16>, vector<2x128xf32> -> vector<2x128xf32>
    %c0_12 = arith.constant 0 : index
    %c0_13 = arith.constant 0 : index
    %13 = vector.load %arg5[%c0_12, %c0_13] : memref<1x128xf32, #tpu.memory_space<vmem>>, vector<1x128xf32>
    %14 = vector.broadcast %13 : vector<1x128xf32> to vector<2x128xf32>
    %15 = arith.addf %12, %14 : vector<2x128xf32>
    %16 = arith.mulf %15, %15 : vector<2x128xf32>
    %cst_14 = arith.constant dense<0.000000e+00> : vector<2xf32>
    %17 = vector.multi_reduction <add>, %16, %cst_14 [1] : vector<2x128xf32> to vector<2xf32>
    %18 = vector.shape_cast %17 : vector<2xf32> to vector<2x1xf32>
    %cst_15 = arith.constant 1.000000e-24 : f32
    %19 = vector.broadcast %cst_15 : f32 to vector<2x1xf32>
    %20 = arith.maximumf %18, %19 : vector<2x1xf32>
    %21 = math.rsqrt %20 : vector<2x1xf32>
    %22 = vector.broadcast %21 : vector<2x1xf32> to vector<2x128xf32>
    %23 = arith.mulf %15, %22 : vector<2x128xf32>
    %c0_16 = arith.constant 0 : index
    %c0_17 = arith.constant 0 : index
    %24 = vector.load %arg6[%c0_16, %c0_17] : memref<2x128xf32, #tpu.memory_space<vmem>>, vector<2x128xf32>
    tpu.vector_store %arg6[%c0_16, %c0_17], %23 {strides = array<i32>} : memref<2x128xf32, #tpu.memory_space<vmem>>, vector<2x128xf32>,
    return
  }
}

module attributes {stable_mosaic.version = 11 : i64} {
  func.func @kern(%arg0: memref<128x128xf32, #tpu.memory_space<vmem>>, %arg1: memref<1x128xf32, #tpu.memory_space<vmem>>, %arg2: memref<128x128xf32, #tpu.memory_space<vmem>>, %arg3: memref<1x128xf32, #tpu.memory_space<vmem>>, %arg4: memref<128x128xf32, #tpu.memory_space<vmem>>, %arg5: memref<1x128xf32, #tpu.memory_space<vmem>>, %arg6: memref<128x128xf32, #tpu.memory_space<vmem>>, %arg7: memref<1x128xf32, #tpu.memory_space<vmem>>, %arg8: memref<128x128xf32, #tpu.memory_space<vmem>>, %arg9: memref<1x128xf32, #tpu.memory_space<vmem>>, %arg10: memref<128x128xf32, #tpu.memory_space<vmem>>, %arg11: memref<1x128xf32, #tpu.memory_space<vmem>>) attributes {dimension_semantics = [], scalar_prefetch = 0 : i64, scratch_operands = 0 : i64, tpu.core_type = #tpu.core_type<tc>} {
    %c0 = arith.constant 0 : index
    %c0_0 = arith.constant 0 : index
    %0 = vector.load %arg4[%c0, %c0_0] : memref<128x128xf32, #tpu.memory_space<vmem>>, vector<128x128xf32>
    %cst = arith.constant 9.990000e-01 : f32
    %1 = vector.broadcast %cst : f32 to vector<128x128xf32>
    %2 = arith.mulf %0, %1 : vector<128x128xf32>
    %c0_1 = arith.constant 0 : index
    %c0_2 = arith.constant 0 : index
    %3 = vector.load %arg0[%c0_1, %c0_2] : memref<128x128xf32, #tpu.memory_space<vmem>>, vector<128x128xf32>
    %cst_3 = arith.constant 1.000000e-03 : f32
    %4 = vector.broadcast %cst_3 : f32 to vector<128x128xf32>
    %5 = arith.mulf %3, %4 : vector<128x128xf32>
    %6 = arith.addf %2, %5 : vector<128x128xf32>
    %c0_4 = arith.constant 0 : index
    %c0_5 = arith.constant 0 : index
    %7 = vector.load %arg8[%c0_4, %c0_5] : memref<128x128xf32, #tpu.memory_space<vmem>>, vector<128x128xf32>
    tpu.vector_store %arg8[%c0_4, %c0_5], %6 {strides = array<i32>} : memref<128x128xf32, #tpu.memory_space<vmem>>, vector<128x128xf32>,
    %c0_6 = arith.constant 0 : index
    %c0_7 = arith.constant 0 : index
    %8 = vector.load %arg5[%c0_6, %c0_7] : memref<1x128xf32, #tpu.memory_space<vmem>>, vector<1x128xf32>
    %cst_8 = arith.constant 9.990000e-01 : f32
    %9 = vector.broadcast %cst_8 : f32 to vector<1x128xf32>
    %10 = arith.mulf %8, %9 : vector<1x128xf32>
    %c0_9 = arith.constant 0 : index
    %c0_10 = arith.constant 0 : index
    %11 = vector.load %arg1[%c0_9, %c0_10] : memref<1x128xf32, #tpu.memory_space<vmem>>, vector<1x128xf32>
    %cst_11 = arith.constant 1.000000e-03 : f32
    %12 = vector.broadcast %cst_11 : f32 to vector<1x128xf32>
    %13 = arith.mulf %11, %12 : vector<1x128xf32>
    %14 = arith.addf %10, %13 : vector<1x128xf32>
    %c0_12 = arith.constant 0 : index
    %c0_13 = arith.constant 0 : index
    %15 = vector.load %arg9[%c0_12, %c0_13] : memref<1x128xf32, #tpu.memory_space<vmem>>, vector<1x128xf32>
    tpu.vector_store %arg9[%c0_12, %c0_13], %14 {strides = array<i32>} : memref<1x128xf32, #tpu.memory_space<vmem>>, vector<1x128xf32>,
    %c0_14 = arith.constant 0 : index
    %c0_15 = arith.constant 0 : index
    %16 = vector.load %arg6[%c0_14, %c0_15] : memref<128x128xf32, #tpu.memory_space<vmem>>, vector<128x128xf32>
    %cst_16 = arith.constant 9.990000e-01 : f32
    %17 = vector.broadcast %cst_16 : f32 to vector<128x128xf32>
    %18 = arith.mulf %16, %17 : vector<128x128xf32>
    %c0_17 = arith.constant 0 : index
    %c0_18 = arith.constant 0 : index
    %19 = vector.load %arg2[%c0_17, %c0_18] : memref<128x128xf32, #tpu.memory_space<vmem>>, vector<128x128xf32>
    %cst_19 = arith.constant 1.000000e-03 : f32
    %20 = vector.broadcast %cst_19 : f32 to vector<128x128xf32>
    %21 = arith.mulf %19, %20 : vector<128x128xf32>
    %22 = arith.addf %18, %21 : vector<128x128xf32>
    %c0_20 = arith.constant 0 : index
    %c0_21 = arith.constant 0 : index
    %23 = vector.load %arg10[%c0_20, %c0_21] : memref<128x128xf32, #tpu.memory_space<vmem>>, vector<128x128xf32>
    tpu.vector_store %arg10[%c0_20, %c0_21], %22 {strides = array<i32>} : memref<128x128xf32, #tpu.memory_space<vmem>>, vector<128x128xf32>,
    %c0_22 = arith.constant 0 : index
    %c0_23 = arith.constant 0 : index
    %24 = vector.load %arg7[%c0_22, %c0_23] : memref<1x128xf32, #tpu.memory_space<vmem>>, vector<1x128xf32>
    %cst_24 = arith.constant 9.990000e-01 : f32
    %25 = vector.broadcast %cst_24 : f32 to vector<1x128xf32>
    %26 = arith.mulf %24, %25 : vector<1x128xf32>
    %c0_25 = arith.constant 0 : index
    %c0_26 = arith.constant 0 : index
    %27 = vector.load %arg3[%c0_25, %c0_26] : memref<1x128xf32, #tpu.memory_space<vmem>>, vector<1x128xf32>
    %cst_27 = arith.constant 1.000000e-03 : f32
    %28 = vector.broadcast %cst_27 : f32 to vector<1x128xf32>
    %29 = arith.mulf %27, %28 : vector<1x128xf32>
    %30 = arith.addf %26, %29 : vector<1x128xf32>
    %c0_28 = arith.constant 0 : index
    %c0_29 = arith.constant 0 : index
    %31 = vector.load %arg11[%c0_28, %c0_29] : memref<1x128xf32, #tpu.memory_space<vmem>>, vector<1x128xf32>
    tpu.vector_store %arg11[%c0_28, %c0_29], %30 {strides = array<i32>} : memref<1x128xf32, #tpu.memory_space<vmem>>, vector<1x128xf32>,
    return
  }
}

module attributes {stable_mosaic.version = 11 : i64} {
  func.func @moco_encoder_kernel(%arg0: memref<512x128xbf16, #tpu.memory_space<vmem>>, %arg1: memref<128x128xbf16, #tpu.memory_space<vmem>>, %arg2: memref<1x128xf32, #tpu.memory_space<vmem>>, %arg3: memref<2x512xf32, #tpu.memory_space<vmem>>, %arg4: memref<128x128xbf16, #tpu.memory_space<vmem>>, %arg5: memref<1x128xf32, #tpu.memory_space<vmem>>, %arg6: memref<2x128xf32, #tpu.memory_space<vmem>>) attributes {dimension_semantics = [], scalar_prefetch = 0 : i64, scratch_operands = 0 : i64, tpu.core_type = #tpu.core_type<tc>} {
    %c0 = arith.constant 0 : index
    %c0_0 = arith.constant 0 : index
    %0 = vector.load %arg0[%c0, %c0_0] : memref<512x128xbf16, #tpu.memory_space<vmem>>, vector<512x128xbf16>
    %c0_1 = arith.constant 0 : index
    %c0_2 = arith.constant 0 : index
    %1 = vector.load %arg1[%c0_1, %c0_2] : memref<128x128xbf16, #tpu.memory_space<vmem>>, vector<128x128xbf16>
    %cst = arith.constant dense<0.000000e+00> : vector<512x128xf32>
    %2 = tpu.matmul %0, %1, %cst {dimension_numbers = #tpu.dot_dimension_numbers<[1], [0], [0], [1], [0, 0, 1, 1], [], []>} : vector<512x128xbf16>, vector<128x128xbf16>, vector<512x128xf32> -> vector<512x128xf32>
    %c0_3 = arith.constant 0 : index
    %c0_4 = arith.constant 0 : index
    %3 = vector.load %arg2[%c0_3, %c0_4] : memref<1x128xf32, #tpu.memory_space<vmem>>, vector<1x128xf32>
    %4 = vector.broadcast %3 : vector<1x128xf32> to vector<512x128xf32>
    %5 = arith.addf %2, %4 : vector<512x128xf32>
    %cst_5 = arith.constant 0.000000e+00 : f32
    %6 = vector.broadcast %cst_5 : f32 to vector<512x128xf32>
    %7 = arith.maximumf %5, %6 : vector<512x128xf32>
    %c0_6 = arith.constant 0 : index
    %c0_7 = arith.constant 0 : index
    %8 = vector.load %arg3[%c0_6, %c0_7] : memref<2x512xf32, #tpu.memory_space<vmem>>, vector<2x512xf32>
    %cst_8 = arith.constant dense<0.000000e+00> : vector<2x128xf32>
    %9 = tpu.matmul %8, %7, %cst_8 {dimension_numbers = #tpu.dot_dimension_numbers<[1], [0], [0], [1], [0, 0, 1, 1], [], []>} : vector<2x512xf32>, vector<512x128xf32>, vector<2x128xf32> -> vector<2x128xf32>
    %10 = arith.truncf %9 : vector<2x128xf32> to vector<2x128xbf16>
    %c0_9 = arith.constant 0 : index
    %c0_10 = arith.constant 0 : index
    %11 = vector.load %arg4[%c0_9, %c0_10] : memref<128x128xbf16, #tpu.memory_space<vmem>>, vector<128x128xbf16>
    %cst_11 = arith.constant dense<0.000000e+00> : vector<2x128xf32>
    %12 = tpu.matmul %10, %11, %cst_11 {dimension_numbers = #tpu.dot_dimension_numbers<[1], [0], [0], [1], [0, 0, 1, 1], [], []>} : vector<2x128xbf16>, vector<128x128xbf16>, vector<2x128xf32> -> vector<2x128xf32>
    %c0_12 = arith.constant 0 : index
    %c0_13 = arith.constant 0 : index
    %13 = vector.load %arg5[%c0_12, %c0_13] : memref<1x128xf32, #tpu.memory_space<vmem>>, vector<1x128xf32>
    %14 = vector.broadcast %13 : vector<1x128xf32> to vector<2x128xf32>
    %15 = arith.addf %12, %14 : vector<2x128xf32>
    %16 = arith.mulf %15, %15 : vector<2x128xf32>
    %cst_14 = arith.constant dense<0.000000e+00> : vector<2xf32>
    %17 = vector.multi_reduction <add>, %16, %cst_14 [1] : vector<2x128xf32> to vector<2xf32>
    %18 = vector.shape_cast %17 : vector<2xf32> to vector<2x1xf32>
    %cst_15 = arith.constant 1.000000e-24 : f32
    %19 = vector.broadcast %cst_15 : f32 to vector<2x1xf32>
    %20 = arith.maximumf %18, %19 : vector<2x1xf32>
    %21 = math.rsqrt %20 : vector<2x1xf32>
    %22 = vector.broadcast %21 : vector<2x1xf32> to vector<2x128xf32>
    %23 = arith.mulf %15, %22 : vector<2x128xf32>
    %c0_16 = arith.constant 0 : index
    %c0_17 = arith.constant 0 : index
    %24 = vector.load %arg6[%c0_16, %c0_17] : memref<2x128xf32, #tpu.memory_space<vmem>>, vector<2x128xf32>
    tpu.vector_store %arg6[%c0_16, %c0_17], %23 {strides = array<i32>} : memref<2x128xf32, #tpu.memory_space<vmem>>, vector<2x128xf32>,
    return
  }
}

</mosaic_0001>

<bundles_post_ra>
// kernel: moco_forward.3
= control target key start
LH: loop header
LB: loop body
LE: loop exit
PB: predicated region body
PF: predicated region fallthrough
CT: control target
= control target key end

     0   :  { %s1719_s0 = inlined_call_operand.vmem [shape: bf16[512,128], index: 0, kind: input, shape index: {}]   ;;  %s1720_s1 = inlined_call_operand.vmem [shape: bf16[128,128], index: 1, kind: input, shape index: {}]   ;;  %s1721_s2 = inlined_call_operand.vmem [shape: f32[1,128], index: 2, kind: input, shape index: {}]   ;;  %s1722_s3 = inlined_call_operand.vmem [shape: f32[2,512], index: 3, kind: input, shape index: {}]   ;;  %s1723_s4 = inlined_call_operand.vmem [shape: bf16[128,128], index: 4, kind: input, shape index: {}]   ;;  %s1724_s5 = inlined_call_operand.vmem [shape: f32[1,128], index: 5, kind: input, shape index: {}]   ;;  %s1725_s6 = inlined_call_operand.hbm [shape: f32[2,128], index: 6, kind: output, shape index: {}]  }
   0x1   :  { %v1276_v0 = vld [vmem:[%s1720_s1 + $0x38] sm:$0xff]   ;;  %v1277_v1 = vld [vmem:[%s1720_s1 + $0x30] sm:$0xff]   ;;  %v1278_v2 = vld [vmem:[%s1720_s1 + $0x28] sm:$0xff]  }
   0x2   :  { %1172 = vmatprep.subr.bf16.mxu0 %v1276_v0  ;;  %v1279_v3 = vld [vmem:[%s1720_s1 + $0x20] sm:$0xff]   ;;  %v1280_v5 = vld [vmem:[%s1720_s1 + $0x18] sm:$0xff]   ;;  %v1281_v6 = vld [vmem:[%s1720_s1 + $0x10] sm:$0xff]  }
   0x3   :  { %1173 = vmatpush3.bf16.msra.mxu0 %v1276_v0  ;;  %v1284_v4 = vld [vmem:[%s1719_s0] sm:$0xff]   ;;  %v1282_v7 = vld [vmem:[%s1720_s1 + $0x8] sm:$0xff]   ;;  %v1286_v10 = vld [vmem:[%s1719_s0 + $0x10] sm:$0xff]  }
   0x4   :  { %1174 = vmatprep.subr.bf16.mxu0 %v1277_v1  ;;  %1188 = vmatprep.mubr.bf16.mxu0 %v1284_v4  ;;  %v1283_v8 = vld [vmem:[%s1720_s1] sm:$0xff]   ;;  %v1285_v9 = vld [vmem:[%s1719_s0 + $0x8] sm:$0xff]   ;;  %v1287_v11 = vld [vmem:[%s1719_s0 + $0x18] sm:$0xff]  }
   0x5   :  { %v1288_v12 = vld [vmem:[%s1719_s0 + $0x20] sm:$0xff]  }
   0x7   :  { %1175 = vmatpush3.bf16.msra.mxu0 %v1277_v1 }
   0x8   :  { %1176 = vmatprep.subr.bf16.mxu0 %v1278_v2 }
   0xb   :  { %1177 = vmatpush3.bf16.msra.mxu0 %v1278_v2 }
   0xc   :  { %1178 = vmatprep.subr.bf16.mxu0 %v1279_v3 }
   0xf   :  { %1179 = vmatpush3.bf16.msra.mxu0 %v1279_v3 }
  0x10   :  { %1180 = vmatprep.subr.bf16.mxu0 %v1280_v5 }
  0x13   :  { %1181 = vmatpush3.bf16.msra.mxu0 %v1280_v5 }
  0x14   :  { %1182 = vmatprep.subr.bf16.mxu0 %v1281_v6 }
  0x17   :  { %1183 = vmatpush3.bf16.msra.mxu0 %v1281_v6 }
  0x18   :  { %1184 = vmatprep.subr.bf16.mxu0 %v1282_v7 }
  0x1b   :  { %1185 = vmatpush3.bf16.msra.mxu0 %v1282_v7 }
  0x1c   :  { %1186 = vmatprep.subr.bf16.mxu0 %v1283_v8 }
  0x1f   :  { %1187 = vmatpush3.bf16.msra.mxu0 %v1283_v8 }
  0x22   :  { %1189 = vmatmul.mubr.bf16.vlgmr.msra.gmra.mxu0 %v1285_v9 }
  0x23   :  { %1192 = vmatprep.mubr.bf16.mxu0 %v1286_v10 }
  0x2a   :  { %1193 = vmatmul.mubr.bf16.gmra.mxu0 %v1287_v11 }
  0x2b   :  { %1196 = vmatprep.mubr.bf16.mxu0 %v1288_v12 }
  0x2c   :  { %11 = vsyncpa [#allocation3], 0  ;;  %v1289_v13 = vld [vmem:[%s1719_s0 + $0x28] sm:$0xff]   ;;  %v1290_v14 = vld [vmem:[%s1719_s0 + $0x30] sm:$0xff]   ;;  %v1349_v40 = vmov 1983009808   ;;  %v711_v42 = vlaneseq }
  0x2d   :  { %v1291_v15 = vld [vmem:[%s1719_s0 + $0x38] sm:$0xff]   ;;  %v1292_v16 = vld [vmem:[%s1719_s0 + $0x40] sm:$0xff]   ;;  %v1293_v17 = vld [vmem:[%s1719_s0 + $0x48] sm:$0xff]   ;;  %v709_v41 = vunpack.c.l.s4 %v1349_v40  ;;  %vm1351_vm0 = vmmov 0   ;;  %vm981_vm1 = vcmask 1041408  }
  0x2e   :  { %v1294_v18 = vld [vmem:[%s1719_s0 + $0x50] sm:$0xff]   ;;  %v1295_v19 = vld [vmem:[%s1719_s0 + $0x58] sm:$0xff]   ;;  %v1296_v20 = vld [vmem:[%s1719_s0 + $0x60] sm:$0xff]   ;;  %v712_v44 = vshrl.u32 %v711_v42, 7 }
  0x2f   :  { %v1297_v21 = vld [vmem:[%s1719_s0 + $0x68] sm:$0xff]   ;;  %v1298_v22 = vld [vmem:[%s1719_s0 + $0x70] sm:$0xff]   ;;  %v1299_v23 = vld [vmem:[%s1719_s0 + $0x78] sm:$0xff]   ;;  %v710_v43 = vunpack.c.0.s8 %v709_v41 }
  0x30   :  { %v1300_v24 = vld [vmem:[%s1719_s0 + $0x80] sm:$0xff]   ;;  %v1301_v25 = vld [vmem:[%s1719_s0 + $0x88] sm:$0xff]   ;;  %v1302_v26 = vld [vmem:[%s1719_s0 + $0x90] sm:$0xff]  }
  0x31   :  { %v1303_v27 = vld [vmem:[%s1719_s0 + $0x98] sm:$0xff]   ;;  %v1304_v28 = vld [vmem:[%s1719_s0 + $0xa0] sm:$0xff]   ;;  %v1305_v29 = vld [vmem:[%s1719_s0 + $0xa8] sm:$0xff]   ;;  %v713_v45 = vsub.s32 %v710_v43, %v712_v44 }
  0x32   :  { %1197 = vmatmul.mubr.bf16.gmra.mxu0 %v1289_v13  ;;  %v1306_v30 = vld [vmem:[%s1719_s0 + $0xb0] sm:$0xff]   ;;  %v1307_v31 = vld [vmem:[%s1719_s0 + $0xb8] sm:$0xff]   ;;  %v1308_v32 = vld [vmem:[%s1719_s0 + $0xc0] sm:$0xff]  }
  0x33   :  { %1200 = vmatprep.mubr.bf16.mxu0 %v1290_v14  ;;  %v1309_v33 = vld [vmem:[%s1719_s0 + $0xc8] sm:$0xff]   ;;  %v1310_v34 = vld [vmem:[%s1719_s0 + $0xd0] sm:$0xff]   ;;  %v1311_v35 = vld [vmem:[%s1719_s0 + $0xd8] sm:$0xff]  }
  0x34   :  { %v1312_v36 = vld [vmem:[%s1719_s0 + $0xe0] sm:$0xff]   ;;  %v1313_v37 = vld [vmem:[%s1719_s0 + $0xe8] sm:$0xff]   ;;  %v1314_v38 = vld [vmem:[%s1719_s0 + $0xf0] sm:$0xff]  }
  0x35   :  { %v1315_v39 = vld [vmem:[%s1719_s0 + $0xf8] sm:$0xff]   ;;  %v705_v46 = vld [vmem:[%s1722_s3] sm:$0xff] }
  0x36   :  { %v1511_v47 = vrot.slane %v705_v46, %v713_v45  ;;  %v707_v62 = vcombine.high %v705_v46, %v705_v46 }
  0x38   :  { %v722_v48 = vcombine.high %v1511_v47, %v1511_v47  ;;  %v1533_v1 = vrot.slane %v707_v62, %v713_v45 }
  0x3a   :  { %1201 = vmatmul.mubr.bf16.gmra.mxu0 %v1291_v15  ;;  %792 = vmatprep.mubr.f32.mxu1 %v722_v48 }
  0x3b   :  { %1204 = vmatprep.mubr.bf16.mxu0 %v1292_v16 }
  0x42   :  { %1205 = vmatmul.mubr.bf16.gmra.mxu0 %v1293_v17  ;;  %v1552_v17 = vld [vmem:[%s1721_s2] ss:$0 sm:$0xff] }
  0x43   :  { %1208 = vmatprep.mubr.bf16.mxu0 %v1294_v18 }
  0x4a   :  { %1209 = vmatmul.mubr.bf16.gmra.mxu0 %v1295_v19 }
  0x4b   :  { %1212 = vmatprep.mubr.bf16.mxu0 %v1296_v20 }
  0x52   :  { %1213 = vmatmul.mubr.bf16.gmra.mxu0 %v1297_v21 }
  0x53   :  { %1216 = vmatprep.mubr.bf16.mxu0 %v1298_v22 }
  0x5a   :  { %1217 = vmatmul.mubr.bf16.gmra.mxu0 %v1299_v23 }
  0x5b   :  { %1220 = vmatprep.mubr.bf16.mxu0 %v1300_v24 }
  0x62   :  { %1221 = vmatmul.mubr.bf16.gmra.mxu0 %v1301_v25 }
  0x63   :  { %1224 = vmatprep.mubr.bf16.mxu0 %v1302_v26 }
  0x6a   :  { %1225 = vmatmul.mubr.bf16.gmra.mxu0 %v1303_v27 }
  0x6b   :  { %1228 = vmatprep.mubr.bf16.mxu0 %v1304_v28 }
  0x72   :  { %1229 = vmatmul.mubr.bf16.gmra.mxu0 %v1305_v29 }
  0x73   :  { %1232 = vmatprep.mubr.bf16.mxu0 %v1306_v30 }
  0x7a   :  { %1233 = vmatmul.mubr.bf16.gmra.mxu0 %v1307_v31 }
  0x7b   :  { %1236 = vmatprep.mubr.bf16.mxu0 %v1308_v32 }
  0x82   :  { %1237 = vmatmul.mubr.bf16.gmra.mxu0 %v1309_v33 }
  0x83   :  { %1240 = vmatprep.mubr.bf16.mxu0 %v1310_v34 }
  0x8a   :  { %1241 = vmatmul.mubr.bf16.gmra.mxu0 %v1311_v35 }
  0x8b   :  { %1244 = vmatprep.mubr.bf16.mxu0 %v1312_v36 }
  0x92   :  { %1245 = vmatmul.mubr.bf16.gmra.mxu0 %v1313_v37 }
  0x93   :  { %1248 = vmatprep.mubr.bf16.mxu0 %v1314_v38 }
  0x9a   :  { %1249 = vmatmul.mubr.bf16.gmra.mxu0 %v1315_v39 }
  0xe2   :  { %v1515_v49 = vpop.f32.mrf.mxu0 }
  0xe4   :  { %v1517_v50 = vpop.f32.mrf.mxu0 }
  0xe6   :  { %v1519_v51 = vpop.f32.mrf.mxu0 }
  0xe8   :  { %v1521_v52 = vpop.f32.mrf.mxu0 }
  0xea   :  { %v1523_v53 = vpop.f32.mrf.mxu0 }
  0xec   :  { %v1525_v54 = vpop.f32.mrf.mxu0 }
  0xee   :  { %v1527_v55 = vpop.f32.mrf.mxu0 }
  0xf0   :  { %v1529_v56 = vpop.f32.mrf.mxu0 }
  0xf2   :  { %v1198_v57 = vpop.f32.mrf.mxu0 }
  0xf3   :  { %v427_v41 = vadd.f32 %v1198_v57, %v1552_v17 }
  0xf4   :  { %v1531_v58 = vpop.f32.mrf.mxu0 }
  0xf5   :  { %v419_v57 = vadd.f32 %v1552_v17, %v1531_v58  ;;  %v411_v58 = vadd.f32 %v1523_v53, %v1552_v17 }
  0xf6   :  { %v1199_v59 = vpop.f32.mrf.mxu0 }
  0xf7   :  { %v430_v36 = vadd.f32 %v1199_v59, %v1552_v17 }
  0xf8   :  { %v421_v60 = vpop.f32.mrf.mxu0 }
  0xf9   :  { %v652_v46 = vmax.f32 %v430_v36, 0.0  ;;  %v422_v48 = vadd.f32 %v1552_v17, %v421_v60  ;;  %v414_v60 = vadd.f32 %v1527_v55, %v1552_v17 }
  0xfa   :  { %v1202_v61 = vpop.f32.mrf.mxu0 }
  0xfb   :  { %v443_v22 = vadd.f32 %v1202_v61, %v1552_v17 }
  0xfc   :  { %v434_v63 = vpop.f32.mrf.mxu0 }
  0xfd   :  { %v655_v31 = vmax.f32 %v443_v22, 0.0  ;;  %v435_v32 = vadd.f32 %v1552_v17, %v434_v63  ;;  %v651_v63 = vmax.f32 %v427_v41, 0.0  ;;  %v647_v22 = vmax.f32 %v411_v58, 0.0 }
  0xfe   :  { %v1203_v0 = vpop.f32.mrf.mxu0 }
  0xff   :  { %v446_v18 = vadd.f32 %v1203_v0, %v1552_v17  ;;  %v653_v42 = vmax.f32 %v435_v32, 0.0 }
 0x100   :  { %v437_v2 = vpop.f32.mrf.mxu0 }
 0x101   :  { %v656_v26 = vmax.f32 %v446_v18, 0.0  ;;  %v438_v27 = vadd.f32 %v1552_v17, %v437_v2 }
 0x102   :  { %v1535_v3 = vpop.f32.mrf.mxu0 }
 0x103   :  { %v654_v37 = vmax.f32 %v438_v27, 0.0 }
 0x104   :  { %v1537_v4 = vpop.f32.mrf.mxu0 }
 0x105   :  { %v451_v36 = vadd.f32 %v1552_v17, %v1537_v4  ;;  %v723_v4 = vcombine.high %v1533_v1, %v1533_v1 }
 0x106   :  { %v1539_v5 = vpop.f32.mrf.mxu0 }
 0x108   :  { %v1541_v6 = vpop.f32.mrf.mxu0 }
 0x10a   :  { %v1543_v7 = vpop.f32.mrf.mxu0 }
 0x10c   :  { %v1545_v8 = vpop.f32.mrf.mxu0 }
 0x10d   :  { %v467_v53 = vadd.f32 %v1552_v17, %v1545_v8  ;;  %v459_v8 = vadd.f32 %v1535_v3, %v1552_v17 }
 0x10e   :  { %v1211_v9 = vpop.f32.mrf.mxu0 }
 0x10f   :  { %v478_v2 = vadd.f32 %v1211_v9, %v1552_v17  ;;  %v659_v3 = vmax.f32 %v459_v8, 0.0 }
 0x110   :  { %v1547_v10 = vpop.f32.mrf.mxu0 }
 0x111   :  { %v664_v9 = vmax.f32 %v478_v2, 0.0  ;;  %v470_v55 = vadd.f32 %v1552_v17, %v1547_v10  ;;  %v462_v10 = vadd.f32 %v1539_v5, %v1552_v17 }
 0x112   :  { %v1214_v11 = vpop.f32.mrf.mxu0 }
 0x113   :  { %v491_v39 = vadd.f32 %v1214_v11, %v1552_v17  ;;  %v660_v5 = vmax.f32 %v462_v10, 0.0 }
 0x114   :  { %v482_v12 = vpop.f32.mrf.mxu0 }
 0x115   :  { %v667_v61 = vmax.f32 %v491_v39, 0.0  ;;  %v483_v62 = vadd.f32 %v1552_v17, %v482_v12  ;;  %v475_v12 = vadd.f32 %v1543_v7, %v1552_v17 }
 0x116   :  { %v1215_v13 = vpop.f32.mrf.mxu0 }
 0x117   :  { %v494_v34 = vadd.f32 %v1215_v13, %v1552_v17  ;;  %v650_v13 = vmax.f32 %v422_v48, 0.0  ;;  %v663_v7 = vmax.f32 %v475_v12, 0.0 }
 0x118   :  { %v485_v14 = vpop.f32.mrf.mxu0 }
 0x119   :  { %v668_v44 = vmax.f32 %v494_v34, 0.0  ;;  %v486_v45 = vadd.f32 %v1552_v17, %v485_v14  ;;  %v390_v34 = vadd.f32 %v1552_v17, %v1521_v52 }
 0x11a   :  { %v1218_v15 = vpop.f32.mrf.mxu0 }
 0x11b   :  { %v507_v20 = vadd.f32 %v1218_v15, %v1552_v17  ;;  %v666_v11 = vmax.f32 %v486_v45, 0.0  ;;  %v665_v15 = vmax.f32 %v483_v62, 0.0 }
 0x11c   :  { %v498_v16 = vpop.f32.mrf.mxu0 }
 0x11d   :  { %v671_v29 = vmax.f32 %v507_v20, 0.0  ;;  %v499_v30 = vadd.f32 %v1552_v17, %v498_v16  ;;  %v649_v16 = vmax.f32 %v419_v57, 0.0  ;;  %v406_v20 = vadd.f32 %v1552_v17, %v1529_v56 }
 0x11e   :  { %v1219_v19 = vpop.f32.mrf.mxu0  ;;  %v398_v56 = vadd.f32 %v1519_v51, %v1552_v17  ;;  %v454_v51 = vadd.f32 %v1552_v17, %v1541_v6  ;;  %v642_v6 = vmax.f32 %v390_v34, 0.0 }
 0x11f   :  { %v510_v21 = vadd.f32 %v1219_v19, %v1552_v17  ;;  %v669_v40 = vmax.f32 %v499_v30, 0.0  ;;  %v648_v19 = vmax.f32 %v414_v60, 0.0 }
 0x120   :  { %v501_v23 = vpop.f32.mrf.mxu0  ;;  %v644_v32 = vmax.f32 %v398_v56, 0.0 }
 0x121   :  { %v502_v24 = vadd.f32 %v1552_v17, %v501_v23  ;;  %v672_v25 = vmax.f32 %v510_v21, 0.0  ;;  %v403_v23 = vadd.f32 %v1552_v17, %v1525_v54  ;;  %v395_v54 = vadd.f32 %v1515_v49, %v1552_v17 }
 0x122   :  { %v1560_v28 = vpop.f32.mrf.mxu0 }
 0x123   :  { %1093 = vmatprep.subr.mxu1 %v672_v25  ;;  %v670_v35 = vmax.f32 %v502_v24, 0.0  ;;  %v662_v25 = vmax.f32 %v470_v55, 0.0  ;;  %v645_v30 = vmax.f32 %v403_v23, 0.0  ;;  %v643_v49 = vmax.f32 %v395_v54, 0.0 }
 0x124   :  { %v1564_v33 = vpop.f32.mrf.mxu0  ;;  %1094 = vmatpush3.msra.mxu1 %v656_v26  ;;  %v646_v26 = vmax.f32 %v406_v20, 0.0 }
 0x125   :  { %1095 = vmatprep.subr.mxu1 %v671_v29  ;;  %v661_v29 = vmax.f32 %v467_v53, 0.0 }
 0x126   :  { %v1568_v38 = vpop.f32.mrf.mxu0  ;;  %1096 = vmatpush3.msra.mxu1 %v655_v31 }
 0x127   :  { %1097 = vmatprep.subr.mxu1 %v670_v35 }
 0x128   :  { %v1572_v43 = vpop.f32.mrf.mxu0  ;;  %1098 = vmatpush3.msra.mxu1 %v654_v37  ;;  %v387_v37 = vadd.f32 %v1552_v17, %v1517_v50 }
 0x129   :  { %1099 = vmatprep.subr.mxu1 %v669_v40  ;;  %v658_v40 = vmax.f32 %v454_v51, 0.0 }
 0x12a   :  { %v1576_v59 = vpop.f32.mrf.mxu0  ;;  %1100 = vmatpush3.msra.mxu1 %v653_v42  ;;  %v657_v42 = vmax.f32 %v451_v36, 0.0  ;;  %v641_v52 = vmax.f32 %v387_v37, 0.0 }
 0x12b   :  { %1101 = vmatprep.subr.mxu1 %v668_v44 }
 0x12c   :  { %v1581_v0 = vpop.f32.mrf.mxu0  ;;  %1102 = vmatpush3.msra.mxu1 %v652_v46 }
 0x12d   :  { %1103 = vmatprep.subr.mxu1 %v667_v61 }
 0x12e   :  { %v1586_v14 = vpop.f32.mrf.mxu0  ;;  %1104 = vmatpush3.msra.mxu1 %v651_v63 }
 0x12f   :  { %1105 = vmatprep.subr.mxu1 %v666_v11 }
 0x130   :  { %v1592_v18 = vpop.f32.mrf.mxu0  ;;  %1106 = vmatpush3.msra.mxu1 %v650_v13 }
 0x131   :  { %1107 = vmatprep.subr.mxu1 %v665_v15 }
 0x132   :  { %v1598_v21 = vpop.f32.mrf.mxu0  ;;  %1108 = vmatpush3.msra.mxu1 %v649_v16 }
 0x133   :  { %1109 = vmatprep.subr.mxu1 %v664_v9  ;;  %v555_v51 = vadd.f32 %v1598_v21, %v1552_v17 }
 0x134   :  { %v1604_v24 = vpop.f32.mrf.mxu0  ;;  %1110 = vmatpush3.msra.mxu1 %v648_v19 }
 0x135   :  { %1111 = vmatprep.subr.mxu1 %v663_v7  ;;  %v683_v37 = vmax.f32 %v555_v51, 0.0 }
 0x136   :  { %v1610_v27 = vpop.f32.mrf.mxu0  ;;  %1112 = vmatpush3.msra.mxu1 %v647_v22 }
 0x137   :  { %1113 = vmatprep.subr.mxu1 %v662_v25 }
 0x138   :  { %v1616_v31 = vpop.f32.mrf.mxu0  ;;  %1114 = vmatpush3.msra.mxu1 %v646_v26 }
 0x139   :  { %1115 = vmatprep.subr.mxu1 %v661_v29  ;;  %v558_v29 = vadd.f32 %v1610_v27, %v1552_v17  ;;  %v550_v36 = vadd.f32 %v1552_v17, %v1616_v31 }
 0x13a   :  { %v1234_v35 = vpop.f32.mrf.mxu0  ;;  %1116 = vmatpush3.msra.mxu1 %v645_v30 }
 0x13b   :  { %1117 = vmatprep.subr.mxu1 %v660_v5  ;;  %v571_v55 = vadd.f32 %v1234_v35, %v1552_v17 }
 0x13c   :  { %v562_v39 = vpop.f32.mrf.mxu0  ;;  %1118 = vmatpush3.msra.mxu1 %v644_v32 }
 0x13d   :  { %1119 = vmatprep.subr.mxu1 %v659_v3  ;;  %v687_v25 = vmax.f32 %v571_v55, 0.0  ;;  %v563_v56 = vadd.f32 %v1552_v17, %v562_v39  ;;  %v684_v3 = vmax.f32 %v558_v29, 0.0  ;;  %v547_v39 = vadd.f32 %v1552_v17, %v1604_v24 }
 0x13e   :  { %v1235_v41 = vpop.f32.mrf.mxu0  ;;  %1120 = vmatpush3.msra.mxu1 %v643_v49 }
 0x13f   :  { %1121 = vmatprep.subr.mxu1 %v658_v40  ;;  %v685_v32 = vmax.f32 %v563_v56, 0.0 }
 0x140   :  { %v565_v44 = vpop.f32.mrf.mxu0  ;;  %1122 = vmatpush3.msra.mxu1 %v642_v6  ;;  %v542_v6 = vadd.f32 %v1586_v14, %v1552_v17 }
 0x141   :  { %1123 = vmatprep.subr.mxu1 %v657_v42  ;;  %v566_v22 = vadd.f32 %v1552_v17, %v565_v44  ;;  %v681_v44 = vmax.f32 %v547_v39, 0.0 }
 0x142   :  { %v1628_v45 = vpop.f32.mrf.mxu0  ;;  %1124 = vmatpush3.msra.mxu1 %v641_v52  ;;  %v539_v52 = vadd.f32 %v1576_v59, %v1552_v17  ;;  %v531_v59 = vadd.f32 %v1552_v17, %v1581_v0 }
 0x143   :  { %793 = vmatmul.mubr.f32.vlgmr.msra.gmra.mxu1 %v1511_v47  ;;  %v574_v47 = vadd.f32 %v1235_v41, %v1552_v17  ;;  %v686_v54 = vmax.f32 %v566_v22, 0.0  ;;  %v682_v41 = vmax.f32 %v550_v36, 0.0  ;;  %v1323_v22 = vld [vmem:[%s1723_s4 + $0x8] sm:$0xff]  }
 0x144   :  { %v1631_v50 = vpop.f32.mrf.mxu0  ;;  %862 = vmatprep.mubr.f32.mxu1 %v723_v4  ;;  %v677_v0 = vmax.f32 %v531_v59, 0.0 }
 0x145   :  { %v688_v53 = vmax.f32 %v574_v47, 0.0 }
 0x146   :  { %v1633_v46 = vpop.f32.mrf.mxu0 }
 0x148   :  { %v1635_v48 = vpop.f32.mrf.mxu0 }
 0x14a   :  { %v1242_v61 = vpop.f32.mrf.mxu0 }
 0x14b   :  { %v603_v31 = vadd.f32 %v1242_v61, %v1552_v17 }
 0x14c   :  { %v1637_v62 = vpop.f32.mrf.mxu0 }
 0x14d   :  { %v695_v14 = vmax.f32 %v603_v31, 0.0  ;;  %v595_v61 = vadd.f32 %v1552_v17, %v1637_v62 }
 0x14e   :  { %v1243_v63 = vpop.f32.mrf.mxu0 }
 0x14f   :  { %v606_v21 = vadd.f32 %v1243_v63, %v1552_v17  ;;  %v680_v63 = vmax.f32 %v542_v6, 0.0  ;;  %v693_v62 = vmax.f32 %v595_v61, 0.0 }
 0x150   :  { %v597_v57 = vpop.f32.mrf.mxu0 }
 0x151   :  { %v696_v24 = vmax.f32 %v606_v21, 0.0  ;;  %v598_v4 = vadd.f32 %v1552_v17, %v597_v57 }
 0x152   :  { %v1246_v2 = vpop.f32.mrf.mxu0 }
 0x153   :  { %v619_v30 = vadd.f32 %v1246_v2, %v1552_v17  ;;  %v534_v2 = vadd.f32 %v1552_v17, %v1592_v18  ;;  %v694_v57 = vmax.f32 %v598_v4, 0.0 }
 0x154   :  { %v610_v11 = vpop.f32.mrf.mxu0 }
 0x155   :  { %v699_v27 = vmax.f32 %v619_v30, 0.0  ;;  %v611_v49 = vadd.f32 %v1552_v17, %v610_v11  ;;  %v679_v11 = vmax.f32 %v539_v52, 0.0  ;;  %v678_v18 = vmax.f32 %v534_v2, 0.0 }
 0x156   :  { %v1247_v60 = vpop.f32.mrf.mxu0 }
 0x157   :  { %v622_v26 = vadd.f32 %v1247_v60, %v1552_v17  ;;  %v697_v42 = vmax.f32 %v611_v49, 0.0  ;;  %v590_v60 = vadd.f32 %v1633_v46, %v1552_v17  ;;  %v582_v46 = vadd.f32 %v1552_v17, %v1635_v48 }
 0x158   :  { %v613_v13 = vpop.f32.mrf.mxu0 }
 0x159   :  { %v700_v34 = vmax.f32 %v622_v26, 0.0  ;;  %v614_v35 = vadd.f32 %v1552_v17, %v613_v13  ;;  %v526_v13 = vadd.f32 %v1568_v38, %v1552_v17  ;;  %v692_v47 = vmax.f32 %v590_v60, 0.0 }
 0x15a   :  { %v1250_v12 = vpop.f32.mrf.mxu0  ;;  %v518_v38 = vadd.f32 %v1552_v17, %v1572_v43  ;;  %v690_v55 = vmax.f32 %v582_v46, 0.0  ;;  %v1317_v43 = vld [vmem:[%s1723_s4 + $0x38] sm:$0xff]  }
 0x15b   :  { %v635_v16 = vadd.f32 %v1250_v12, %v1552_v17  ;;  %v698_v40 = vmax.f32 %v614_v35, 0.0  ;;  %v587_v12 = vadd.f32 %v1628_v45, %v1552_v17  ;;  %v579_v45 = vadd.f32 %v1552_v17, %v1631_v50 }
 0x15c   :  { %v626_v15 = vpop.f32.mrf.mxu0  ;;  %v1350_v50 = vmov 0.0  }
 0x15d   :  { %v703_v23 = vmax.f32 %v635_v16, 0.0  ;;  %v627_v10 = vadd.f32 %v1552_v17, %v626_v15  ;;  %v523_v15 = vadd.f32 %v1560_v28, %v1552_v17  ;;  %v691_v16 = vmax.f32 %v587_v12, 0.0 }
 0x15e   :  { %v1251_v58 = vpop.f32.mrf.mxu0  ;;  %v515_v28 = vadd.f32 %v1552_v17, %v1564_v33  ;;  %v689_v48 = vmax.f32 %v579_v45, 0.0  ;;  %v1319_v33 = vld [vmem:[%s1723_s4 + $0x28] sm:$0xff]  }
 0x15f   :  { %v638_v9 = vadd.f32 %v1251_v58, %v1552_v17  ;;  %v701_v5 = vmax.f32 %v627_v10, 0.0  ;;  %v676_v58 = vmax.f32 %v526_v13, 0.0 }
 0x160   :  { %v629_v19 = vpop.f32.mrf.mxu0 }
 0x161   :  { %v704_v20 = vmax.f32 %v638_v9, 0.0  ;;  %v630_v7 = vadd.f32 %v1552_v17, %v629_v19  ;;  %v675_v9 = vmax.f32 %v523_v15, 0.0  ;;  %v674_v19 = vmax.f32 %v518_v38, 0.0  ;;  %v1318_v17 = vld [vmem:[%s1723_s4 + $0x30] sm:$0xff]  }
 0x163   :  { %1128 = vmatprep.subr.mxu1 %v704_v20  ;;  %v702_v8 = vmax.f32 %v630_v7, 0.0  ;;  %v673_v20 = vmax.f32 %v515_v28, 0.0  ;;  %v1321_v7 = vld [vmem:[%s1723_s4 + $0x18] sm:$0xff]  }
 0x164   :  { %1129 = vmatpush3.msra.mxu1 %v688_v53  ;;  %v1322_v53 = vld [vmem:[%s1723_s4 + $0x10] sm:$0xff]  }
 0x165   :  { %1130 = vmatprep.subr.mxu1 %v703_v23  ;;  %v1324_v23 = vld [vmem:[%s1723_s4] sm:$0xff]  }
 0x166   :  { %1131 = vmatpush3.msra.mxu1 %v687_v25 }
 0x167   :  { %1132 = vmatprep.subr.mxu1 %v702_v8 }
 0x168   :  { %1133 = vmatpush3.msra.mxu1 %v686_v54 }
 0x169   :  { %1134 = vmatprep.subr.mxu1 %v701_v5  ;;  %v1044_v5 = vld [vmem:[%s1724_s5] ss:$0 sm:$0xff] }
 0x16a   :  { %1135 = vmatpush3.msra.mxu1 %v685_v32 }
 0x16b   :  { %1136 = vmatprep.subr.mxu1 %v700_v34 }
 0x16c   :  { %1137 = vmatpush3.msra.mxu1 %v684_v3 }
 0x16d   :  { %1138 = vmatprep.subr.mxu1 %v699_v27 }
 0x16e   :  { %1139 = vmatpush3.msra.mxu1 %v683_v37 }
 0x16f   :  { %1140 = vmatprep.subr.mxu1 %v698_v40 }
 0x170   :  { %1141 = vmatpush3.msra.mxu1 %v682_v41 }
 0x171   :  { %1142 = vmatprep.subr.mxu1 %v697_v42 }
 0x172   :  { %1143 = vmatpush3.msra.mxu1 %v681_v44 }
 0x173   :  { %1144 = vmatprep.subr.mxu1 %v696_v24 }
 0x174   :  { %1145 = vmatpush3.msra.mxu1 %v680_v63 }
 0x175   :  { %1146 = vmatprep.subr.mxu1 %v695_v14 }
 0x176   :  { %1147 = vmatpush3.msra.mxu1 %v679_v11 }
 0x177   :  { %1148 = vmatprep.subr.mxu1 %v694_v57 }
 0x178   :  { %1149 = vmatpush3.msra.mxu1 %v678_v18 }
 0x179   :  { %1150 = vmatprep.subr.mxu1 %v693_v62 }
 0x17a   :  { %1151 = vmatpush3.msra.mxu1 %v677_v0 }
 0x17b   :  { %1152 = vmatprep.subr.mxu1 %v692_v47 }
 0x17c   :  { %1153 = vmatpush3.msra.mxu1 %v676_v58 }
 0x17d   :  { %1154 = vmatprep.subr.mxu1 %v691_v16 }
 0x17e   :  { %1155 = vmatpush3.msra.mxu1 %v675_v9 }
 0x17f   :  { %1156 = vmatprep.subr.mxu1 %v690_v55 }
 0x180   :  { %1157 = vmatpush3.msra.mxu1 %v674_v19 }
 0x181   :  { %1158 = vmatprep.subr.mxu1 %v689_v48 }
 0x182   :  { %1159 = vmatpush3.msra.mxu1 %v673_v20 }
 0x183   :  { %863 = vmatmul.mubr.f32.vlgmr.msra.gmra.mxu1 %v1533_v1  ;;  %1252 = vmatprep.subr.bf16.mxu1 %v1350_v50  ;;  %v1320_v1 = vld [vmem:[%s1723_s4 + $0x20] sm:$0xff]   ;;  %s1352_s4 = smov [#allocation2]  }
 0x184   :  { %1253 = vmatpush3.bf16.msra.mxu1 %v1317_v43  ;;  %1268 = vmatprep.mubr.msk.bf16.mxu1 %vm1351_vm0, %v1350_v50  ;;  %s995_s21 = sshll.u32 %s1352_s4, 4  ;;  %s996_s21 = int_to_ptr.vmem [resolvable:$true] %s995_s21 }
 0x185   :  { %1254 = vmatprep.subr.bf16.mxu1 %v1350_v50  ;;  %s1327_s22 = scalar_lea.vmem %s996_s21, 32  ;;  %p1332_p1 = scmp.lt.s32.totalorder %s996_s21, %s996_s21 }
 0x186   :  { %p1328_p0 = scmp.ne.s32.totalorder %s996_s21, %s1327_s22  ;;  %p1333_p2 = scmp.lt.s32.totalorder %s1327_s22, %s1327_s22 }
 0x188   :  { %1255 = vmatpush3.bf16.msra.mxu1 %v1318_v17  ;;  %p1334_p3 = por %p1333_p2, %p1332_p1 }
 0x189   :  { %1256 = vmatprep.subr.bf16.mxu1 %v1350_v50 }
 0x18a   :  { %p1335_p4 = pnand %p1334_p3, %p1328_p0 }
 0x18c   :  { %1257 = vmatpush3.bf16.msra.mxu1 %v1319_v33 }
 0x18d   :  { %1258 = vmatprep.subr.bf16.mxu1 %v1350_v50 }
 0x190   :  { %1259 = vmatpush3.bf16.msra.mxu1 %v1320_v1 }
 0x191   :  { %1260 = vmatprep.subr.bf16.mxu1 %v1350_v50 }
 0x194   :  { %1261 = vmatpush3.bf16.msra.mxu1 %v1321_v7 }
 0x195   :  { %1262 = vmatprep.subr.bf16.mxu1 %v1350_v50 }
 0x198   :  { %1263 = vmatpush3.bf16.msra.mxu1 %v1322_v53 }
 0x199   :  { %1264 = vmatprep.subr.bf16.mxu1 %v1350_v50 }
 0x19c   :  { %1265 = vmatpush3.bf16.msra.mxu1 %v1323_v22 }
 0x19d   :  { %1266 = vmatprep.subr.bf16.mxu1 %v1350_v50 }
 0x1a0   :  { %1267 = vmatpush3.bf16.msra.mxu1 %v1324_v23 }
 0x203   :  { %v1125_v10 = vpop.f32.mrf.mxu1 }
 0x205   :  { %v1126_v25 = vpop.f32.mrf.mxu1 }
 0x206   :  { %v1127_v8 = vadd.f32 %v1126_v25, %v1125_v10 }
 0x243   :  { %v1160_v56 = vpop.f32.mrf.mxu1 }
 0x245   :  { %v1161_v26 = vpop.f32.mrf.mxu1 }
 0x246   :  { %v1162_v29 = vadd.f32 %v1161_v26, %v1160_v56 }
 0x248   :  { %v865_v54 = vadd.f32 %v1162_v29, %v1127_v8 }
 0x24a   :  { %v868_v30 = vpack.c.bf16 %v865_v54, %v865_v54 }
 0x24c   :  { %1269 = vmatmul.mubr.bf16.vlgmr.msra.gmra.mxu1 %v868_v30 }
 0x30c   :  { %v974_v51 = vpop.f32.mrf.mxu1 }
 0x30d   :  { %v975_v32 = vadd.f32 %v1044_v5, %v974_v51 }
 0x30e   :  { %v1270_v34 = vpop.f32.mrf.mxu1 }
 0x30f   :  { %v980_v35 = vmul.f32 %v975_v32, %v975_v32 }
 0x310   :  { %v977_v3 = vpop.f32.mrf.mxu1 }
 0x311   :  { %v982_v36 = vsel %vm981_vm1, %v980_v35, 0.0 }
 0x312   :  { %v1271_v27 = vpop.f32.mrf.mxu1  ;;  %983 = vadd.xlane.f32.xlu0 %v982_v36 }
 0x39b   :  { %v984_v49 = vpop.xlane.xlu0 %983 }
 0x39c   :  { %v985_v37 = vmax.f32 %v984_v49, 1e-24 }
 0x39e   :  { %1325 = vrsqrt.f32 %v985_v37 }
 0x3ab   :  { %v1326_v39 = vpop.eup %1325 }
 0x3ac   :  { %v987_v21 = vmul.f32 %v1326_v39, %v975_v32 }
 0x3ae   :  { %988 = vst [vmem:[#allocation2] sm:$0x3] %v987_v21 }
 0x3af   :  { %1338 = shalt.err (!%p1335_p4)
}
 0x3b0   :  { %998 = dma.vmem_to_hbm [thread:$0]  %s996_s21, 32, %s1725_s6, [#allocation3]  }
 0x3b1   :  { %1347 = dma.done.wait [#allocation3], 32  }
 0x3b2   :  { %1348 = vsyncadd [#allocation3], 4294967264 }
 0x3b3   :  { %1002 = vsyncpa [#allocation3], 1 }

// kernel: moco_forward.4
= control target key start
LH: loop header
LB: loop body
LE: loop exit
PB: predicated region body
PF: predicated region fallthrough
CT: control target
= control target key end

     0   :  { %s619_s0 = inlined_call_operand.vmem [shape: f32[128,128], index: 0, kind: input, shape index: {}]   ;;  %s620_s4 = inlined_call_operand.vmem [shape: f32[128,128], index: 4, kind: input, shape index: {}, may-alias: {4,8}]   ;;  %s621_s8 = inlined_call_operand.vmem [shape: f32[128,128], index: 8, kind: output, shape index: {0}, may-alias: {4,8}]   ;;  %s622_s5 = inlined_call_operand.vmem [shape: f32[1,128], index: 5, kind: input, shape index: {}, may-alias: {5,9}]   ;;  %s623_s1 = inlined_call_operand.vmem [shape: f32[1,128], index: 1, kind: input, shape index: {}]   ;;  %s624_s2 = inlined_call_operand.vmem [shape: f32[128,128], index: 2, kind: input, shape index: {}]   ;;  %s625_s6 = inlined_call_operand.vmem [shape: f32[128,128], index: 6, kind: input, shape index: {}, may-alias: {6,10}]   ;;  %s626_s9 = inlined_call_operand.vmem [shape: f32[1,128], index: 9, kind: output, shape index: {1}, may-alias: {5,9}]   ;;  %s627_s10 = inlined_call_operand.vmem [shape: f32[128,128], index: 10, kind: output, shape index: {2}, may-alias: {6,10}]   ;;  %s628_s7 = inlined_call_operand.vmem [shape: f32[1,128], index: 7, kind: input, shape index: {}, may-alias: {7,11}]   ;;  %s629_s3 = inlined_call_operand.vmem [shape: f32[1,128], index: 3, kind: input, shape index: {}]   ;;  %s630_s11 = inlined_call_operand.vmem [shape: f32[1,128], index: 11, kind: output, shape index: {3}, may-alias: {7,11}]  }
   0x1   :  { %v33_v0 = vld [vmem:[%s620_s4] sm:$0xff]  ;;  %v34_v2 = vld [vmem:[%s620_s4 + $0x8] sm:$0xff]  ;;  %v35_v7 = vld [vmem:[%s620_s4 + $0x10] sm:$0xff] }
   0x2   :  { %v65_v1 = vld [vmem:[%s619_s0] sm:$0xff]  ;;  %v49_v3 = vmul.f32 0.999, %v33_v0  ;;  %v50_v5 = vmul.f32 0.999, %v34_v2  ;;  %v66_v6 = vld [vmem:[%s619_s0 + $0x8] sm:$0xff] }
   0x3   :  { %v81_v4 = vmul.f32 0.001, %v65_v1  ;;  %v67_v8 = vld [vmem:[%s619_s0 + $0x10] sm:$0xff]  ;;  %v82_v10 = vmul.f32 0.001, %v66_v6  ;;  %v36_v13 = vld [vmem:[%s620_s4 + $0x18] sm:$0xff] }
   0x4   :  { %v51_v11 = vmul.f32 0.999, %v35_v7  ;;  %v83_v12 = vmul.f32 0.001, %v67_v8  ;;  %v68_v14 = vld [vmem:[%s619_s0 + $0x18] sm:$0xff]  ;;  %v37_v15 = vld [vmem:[%s620_s4 + $0x20] sm:$0xff] }
   0x5   :  { %v97_v9 = vadd.f32 %v81_v4, %v49_v3  ;;  %v98_v16 = vadd.f32 %v82_v10, %v50_v5  ;;  %v52_v18 = vmul.f32 0.999, %v36_v13  ;;  %v84_v19 = vmul.f32 0.001, %v68_v14  ;;  %v69_v20 = vld [vmem:[%s619_s0 + $0x20] sm:$0xff]  ;;  %v70_v26 = vld [vmem:[%s619_s0 + $0x28] sm:$0xff] }
   0x6   :  { %v99_v17 = vadd.f32 %v83_v12, %v51_v11  ;;  %v53_v22 = vmul.f32 0.999, %v37_v15  ;;  %v85_v23 = vmul.f32 0.001, %v69_v20  ;;  %v71_v28 = vld [vmem:[%s619_s0 + $0x30] sm:$0xff]  ;;  %v72_v34 = vld [vmem:[%s619_s0 + $0x38] sm:$0xff] }
   0x7   :  { %113 = vst [vmem:[%s621_s8] sm:$0xff] %v97_v9  ;;  %v100_v25 = vadd.f32 %v84_v19, %v52_v18  ;;  %v86_v30 = vmul.f32 0.001, %v70_v26  ;;  %v87_v32 = vmul.f32 0.001, %v71_v28  ;;  %v88_v39 = vmul.f32 0.001, %v72_v34 }
   0x8   :  { %v101_v29 = vadd.f32 %v85_v23, %v53_v22  ;;  %v73_v40 = vld [vmem:[%s619_s0 + $0x40] sm:$0xff]  ;;  %v74_v46 = vld [vmem:[%s619_s0 + $0x48] sm:$0xff]  ;;  %v75_v48 = vld [vmem:[%s619_s0 + $0x50] sm:$0xff] }
   0x9   :  { %v89_v43 = vmul.f32 0.001, %v73_v40  ;;  %v90_v50 = vmul.f32 0.001, %v74_v46  ;;  %v91_v52 = vmul.f32 0.001, %v75_v48 }
   0xa   :  { %v76_v54 = vld [vmem:[%s619_s0 + $0x58] sm:$0xff]  ;;  %v77_v60 = vld [vmem:[%s619_s0 + $0x60] sm:$0xff]  ;;  %v78_v2 = vld [vmem:[%s619_s0 + $0x68] sm:$0xff] }
   0xb   :  { %v92_v59 = vmul.f32 0.001, %v76_v54  ;;  %v93_v63 = vmul.f32 0.001, %v77_v60  ;;  %v79_v4 = vld [vmem:[%s619_s0 + $0x70] sm:$0xff]  ;;  %v80_v10 = vld [vmem:[%s619_s0 + $0x78] sm:$0xff] }
   0xc   :  { %v94_v6 = vmul.f32 0.001, %v78_v2  ;;  %v95_v8 = vmul.f32 0.001, %v79_v4  ;;  %v129_v11 = vld [vmem:[%s622_s5] sm:$0x1] }
   0xd   :  { %v96_v15 = vmul.f32 0.001, %v80_v10  ;;  %v135_v19 = vld [vmem:[%s625_s6] sm:$0xff]  ;;  %v138_v34 = vld [vmem:[%s625_s6 + $0x18] sm:$0xff] }
   0xe   :  { %v38_v21 = vld [vmem:[%s620_s4 + $0x28] sm:$0xff]  ;;  %v167_v20 = vld [vmem:[%s624_s2] sm:$0xff]  ;;  %v151_v22 = vmul.f32 0.999, %v135_v19 }
   0xf   :  { %v54_v24 = vmul.f32 0.999, %v38_v21  ;;  %114 = vst [vmem:[%s621_s8 + $0x8] sm:$0xff] %v98_v16  ;;  %115 = vst [vmem:[%s621_s8 + $0x10] sm:$0xff] %v99_v17  ;;  %v131_v16 = vld [vmem:[%s623_s1] sm:$0x1] }
  0x10   :  { %v130_v17 = vmul.f32 0.999, %v129_v11  ;;  %v132_v18 = vmul.f32 0.001, %v131_v16  ;;  %v183_v23 = vmul.f32 0.001, %v167_v20 }
  0x11   :  { %v102_v36 = vadd.f32 %v86_v30, %v54_v24  ;;  %v136_v24 = vld [vmem:[%s625_s6 + $0x8] sm:$0xff]  ;;  %v169_v30 = vld [vmem:[%s624_s2 + $0x10] sm:$0xff]  ;;  %v171_v40 = vld [vmem:[%s624_s2 + $0x20] sm:$0xff] }
  0x12   :  { %v133_v26 = vadd.f32 %v132_v18, %v130_v17  ;;  %v175_v60 = vld [vmem:[%s624_s2 + $0x40] sm:$0xff]  ;;  %v178_v11 = vld [vmem:[%s624_s2 + $0x58] sm:$0xff] }
  0x13   :  { %v179_v16 = vld [vmem:[%s624_s2 + $0x60] sm:$0xff] }
  0x14   :  { %134 = vst [vmem:[%s626_s9] sm:$0x1] %v133_v26  ;;  %v195_v19 = vmul.f32 0.001, %v179_v16  ;;  %v181_v26 = vld [vmem:[%s624_s2 + $0x70] sm:$0xff] }
  0x16   :  { %v39_v27 = vld [vmem:[%s620_s4 + $0x30] sm:$0xff] }
  0x17   :  { %v55_v31 = vmul.f32 0.999, %v39_v27  ;;  %116 = vst [vmem:[%s621_s8 + $0x18] sm:$0xff] %v100_v25  ;;  %v168_v25 = vld [vmem:[%s624_s2 + $0x8] sm:$0xff]  ;;  %v152_v27 = vmul.f32 0.999, %v136_v24 }
  0x18   :  { %v184_v28 = vmul.f32 0.001, %v168_v25 }
  0x19   :  { %v103_v37 = vadd.f32 %v87_v32, %v55_v31  ;;  %v199_v31 = vadd.f32 %v183_v23, %v151_v22 }
  0x1e   :  { %v40_v33 = vld [vmem:[%s620_s4 + $0x38] sm:$0xff]  ;;  %v41_v35 = vld [vmem:[%s620_s4 + $0x40] sm:$0xff] }
  0x1f   :  { %117 = vst [vmem:[%s621_s8 + $0x20] sm:$0xff] %v101_v29  ;;  %v56_v38 = vmul.f32 0.999, %v40_v33  ;;  %v57_v42 = vmul.f32 0.999, %v41_v35  ;;  %v137_v29 = vld [vmem:[%s625_s6 + $0x10] sm:$0xff] }
  0x20   :  { %v153_v32 = vmul.f32 0.999, %v137_v29  ;;  %v185_v33 = vmul.f32 0.001, %v169_v30  ;;  %v170_v35 = vld [vmem:[%s624_s2 + $0x18] sm:$0xff] }
  0x21   :  { %v104_v45 = vadd.f32 %v88_v39, %v56_v38  ;;  %v105_v49 = vadd.f32 %v89_v43, %v57_v42  ;;  %v186_v38 = vmul.f32 0.001, %v170_v35  ;;  %v139_v39 = vld [vmem:[%s625_s6 + $0x20] sm:$0xff]  ;;  %v187_v43 = vmul.f32 0.001, %v171_v40 }
  0x22   :  { %215 = vst [vmem:[%s627_s10] sm:$0xff] %v199_v31  ;;  %v155_v42 = vmul.f32 0.999, %v139_v39  ;;  %v197_v29 = vmul.f32 0.001, %v181_v26  ;;  %v182_v31 = vld [vmem:[%s624_s2 + $0x78] sm:$0xff] }
  0x23   :  { %v231_v35 = vld [vmem:[%s628_s7] sm:$0x1] }
  0x26   :  { %v42_v41 = vld [vmem:[%s620_s4 + $0x48] sm:$0xff] }
  0x27   :  { %v58_v44 = vmul.f32 0.999, %v42_v41  ;;  %118 = vst [vmem:[%s621_s8 + $0x28] sm:$0xff] %v102_v36  ;;  %119 = vst [vmem:[%s621_s8 + $0x30] sm:$0xff] %v103_v37  ;;  %v200_v36 = vadd.f32 %v184_v28, %v152_v27  ;;  %v154_v37 = vmul.f32 0.999, %v138_v34  ;;  %v201_v41 = vadd.f32 %v185_v33, %v153_v32 }
  0x28   :  { %v198_v34 = vmul.f32 0.001, %v182_v31 }
  0x29   :  { %v106_v56 = vadd.f32 %v90_v50, %v58_v44  ;;  %v140_v44 = vld [vmem:[%s625_s6 + $0x28] sm:$0xff]  ;;  %v202_v46 = vadd.f32 %v186_v38, %v154_v37  ;;  %v173_v50 = vld [vmem:[%s624_s2 + $0x30] sm:$0xff]  ;;  %v232_v37 = vmul.f32 0.999, %v231_v35  ;;  %v233_v38 = vld [vmem:[%s629_s3] sm:$0x1] }
  0x2a   :  { %216 = vst [vmem:[%s627_s10 + $0x8] sm:$0xff] %v200_v36  ;;  %v234_v40 = vmul.f32 0.001, %v233_v38 }
  0x2e   :  { %v43_v47 = vld [vmem:[%s620_s4 + $0x50] sm:$0xff] }
  0x2f   :  { %v59_v51 = vmul.f32 0.999, %v43_v47  ;;  %120 = vst [vmem:[%s621_s8 + $0x38] sm:$0xff] %v104_v45  ;;  %v172_v45 = vld [vmem:[%s624_s2 + $0x28] sm:$0xff]  ;;  %v156_v47 = vmul.f32 0.999, %v140_v44 }
  0x30   :  { %v188_v48 = vmul.f32 0.001, %v172_v45 }
  0x31   :  { %v107_v57 = vadd.f32 %v91_v52, %v59_v51  ;;  %v203_v51 = vadd.f32 %v187_v43, %v155_v42 }
  0x36   :  { %v44_v53 = vld [vmem:[%s620_s4 + $0x58] sm:$0xff]  ;;  %v45_v55 = vld [vmem:[%s620_s4 + $0x60] sm:$0xff] }
  0x37   :  { %121 = vst [vmem:[%s621_s8 + $0x40] sm:$0xff] %v105_v49  ;;  %v60_v58 = vmul.f32 0.999, %v44_v53  ;;  %v61_v62 = vmul.f32 0.999, %v45_v55  ;;  %v141_v49 = vld [vmem:[%s625_s6 + $0x30] sm:$0xff] }
  0x38   :  { %217 = vst [vmem:[%s627_s10 + $0x10] sm:$0xff] %v201_v41  ;;  %v157_v52 = vmul.f32 0.999, %v141_v49  ;;  %v189_v53 = vmul.f32 0.001, %v173_v50  ;;  %v174_v55 = vld [vmem:[%s624_s2 + $0x38] sm:$0xff]  ;;  %v235_v41 = vadd.f32 %v234_v40, %v232_v37 }
  0x39   :  { %v108_v1 = vadd.f32 %v92_v59, %v60_v58  ;;  %v109_v5 = vadd.f32 %v93_v63, %v61_v62  ;;  %v190_v58 = vmul.f32 0.001, %v174_v55  ;;  %v191_v63 = vmul.f32 0.001, %v175_v60 }
  0x3a   :  { %236 = vst [vmem:[%s630_s11] sm:$0x1] %v235_v41 }
  0x3e   :  { %v46_v61 = vld [vmem:[%s620_s4 + $0x68] sm:$0xff] }
  0x3f   :  { %v62_v0 = vmul.f32 0.999, %v46_v61  ;;  %122 = vst [vmem:[%s621_s8 + $0x48] sm:$0xff] %v106_v56  ;;  %123 = vst [vmem:[%s621_s8 + $0x50] sm:$0xff] %v107_v57  ;;  %v142_v54 = vld [vmem:[%s625_s6 + $0x38] sm:$0xff]  ;;  %v204_v56 = vadd.f32 %v188_v48, %v156_v47  ;;  %v205_v61 = vadd.f32 %v189_v53, %v157_v52 }
  0x40   :  { %218 = vst [vmem:[%s627_s10 + $0x18] sm:$0xff] %v202_v46  ;;  %v158_v57 = vmul.f32 0.999, %v142_v54 }
  0x41   :  { %v110_v12 = vadd.f32 %v94_v6, %v62_v0  ;;  %v177_v6 = vld [vmem:[%s624_s2 + $0x50] sm:$0xff] }
  0x42   :  { %v206_v2 = vadd.f32 %v190_v58, %v158_v57 }
  0x46   :  { %v47_v3 = vld [vmem:[%s620_s4 + $0x70] sm:$0xff] }
  0x47   :  { %v63_v7 = vmul.f32 0.999, %v47_v3  ;;  %124 = vst [vmem:[%s621_s8 + $0x58] sm:$0xff] %v108_v1  ;;  %v143_v59 = vld [vmem:[%s625_s6 + $0x40] sm:$0xff]  ;;  %v176_v1 = vld [vmem:[%s624_s2 + $0x48] sm:$0xff] }
  0x48   :  { %219 = vst [vmem:[%s627_s10 + $0x20] sm:$0xff] %v203_v51  ;;  %v159_v62 = vmul.f32 0.999, %v143_v59  ;;  %v192_v4 = vmul.f32 0.001, %v176_v1 }
  0x49   :  { %v111_v13 = vadd.f32 %v95_v8, %v63_v7 }
  0x4a   :  { %v207_v7 = vadd.f32 %v191_v63, %v159_v62 }
  0x4e   :  { %v48_v9 = vld [vmem:[%s620_s4 + $0x78] sm:$0xff] }
  0x4f   :  { %125 = vst [vmem:[%s621_s8 + $0x60] sm:$0xff] %v109_v5  ;;  %v64_v14 = vmul.f32 0.999, %v48_v9  ;;  %126 = vst [vmem:[%s621_s8 + $0x68] sm:$0xff] %v110_v12  ;;  %v144_v0 = vld [vmem:[%s625_s6 + $0x48] sm:$0xff] }
  0x50   :  { %127 = vst [vmem:[%s621_s8 + $0x70] sm:$0xff] %v111_v13  ;;  %220 = vst [vmem:[%s627_s10 + $0x28] sm:$0xff] %v204_v56  ;;  %v160_v3 = vmul.f32 0.999, %v144_v0  ;;  %v193_v9 = vmul.f32 0.001, %v177_v6 }
  0x51   :  { %v112_v21 = vadd.f32 %v96_v15, %v64_v14  ;;  %v194_v14 = vmul.f32 0.001, %v178_v11 }
  0x52   :  { %v208_v12 = vadd.f32 %v192_v4, %v160_v3 }
  0x53   :  { %128 = vst [vmem:[%s621_s8 + $0x78] sm:$0xff] %v112_v21  ;;  %v180_v21 = vld [vmem:[%s624_s2 + $0x68] sm:$0xff] }
  0x54   :  { %v196_v24 = vmul.f32 0.001, %v180_v21 }
  0x57   :  { %v145_v5 = vld [vmem:[%s625_s6 + $0x50] sm:$0xff] }
  0x58   :  { %221 = vst [vmem:[%s627_s10 + $0x30] sm:$0xff] %v205_v61  ;;  %v161_v8 = vmul.f32 0.999, %v145_v5 }
  0x5a   :  { %v209_v17 = vadd.f32 %v193_v9, %v161_v8 }
  0x5f   :  { %v146_v10 = vld [vmem:[%s625_s6 + $0x58] sm:$0xff] }
  0x60   :  { %222 = vst [vmem:[%s627_s10 + $0x38] sm:$0xff] %v206_v2  ;;  %v162_v13 = vmul.f32 0.999, %v146_v10 }
  0x62   :  { %v210_v22 = vadd.f32 %v194_v14, %v162_v13 }
  0x67   :  { %v147_v15 = vld [vmem:[%s625_s6 + $0x60] sm:$0xff] }
  0x68   :  { %223 = vst [vmem:[%s627_s10 + $0x40] sm:$0xff] %v207_v7  ;;  %v163_v18 = vmul.f32 0.999, %v147_v15 }
  0x6a   :  { %v211_v27 = vadd.f32 %v195_v19, %v163_v18 }
  0x6f   :  { %v148_v20 = vld [vmem:[%s625_s6 + $0x68] sm:$0xff] }
  0x70   :  { %224 = vst [vmem:[%s627_s10 + $0x48] sm:$0xff] %v208_v12  ;;  %v164_v23 = vmul.f32 0.999, %v148_v20 }
  0x72   :  { %v212_v32 = vadd.f32 %v196_v24, %v164_v23 }
  0x77   :  { %v149_v25 = vld [vmem:[%s625_s6 + $0x70] sm:$0xff] }
  0x78   :  { %225 = vst [vmem:[%s627_s10 + $0x50] sm:$0xff] %v209_v17  ;;  %v165_v28 = vmul.f32 0.999, %v149_v25 }
  0x7a   :  { %v213_v36 = vadd.f32 %v197_v29, %v165_v28 }
  0x7f   :  { %v150_v30 = vld [vmem:[%s625_s6 + $0x78] sm:$0xff] }
  0x80   :  { %226 = vst [vmem:[%s627_s10 + $0x58] sm:$0xff] %v210_v22  ;;  %v166_v33 = vmul.f32 0.999, %v150_v30  ;;  %227 = vst [vmem:[%s627_s10 + $0x60] sm:$0xff] %v211_v27 }
  0x81   :  { %228 = vst [vmem:[%s627_s10 + $0x68] sm:$0xff] %v212_v32  ;;  %229 = vst [vmem:[%s627_s10 + $0x70] sm:$0xff] %v213_v36 }
  0x82   :  { %v214_v39 = vadd.f32 %v198_v34, %v166_v33 }
  0x84   :  { %230 = vst [vmem:[%s627_s10 + $0x78] sm:$0xff] %v214_v39 }

// kernel: moco_forward.5
= control target key start
LH: loop header
LB: loop body
LE: loop exit
PB: predicated region body
PF: predicated region fallthrough
CT: control target
= control target key end

     0   :  { %v1315_v40 = vmov 1983009808   ;;  %v710_v42 = vlaneseq  ;;  %vm1317_vm0 = vmmov 0   ;;  %vm980_vm1 = vcmask 1041408   ;;  %s1684_s1 = inlined_call_operand.vmem [shape: bf16[128,128], index: 1, kind: input, shape index: {}]   ;;  %s1685_s0 = inlined_call_operand.vmem [shape: bf16[512,128], index: 0, kind: input, shape index: {}]   ;;  %s1686_s3 = inlined_call_operand.vmem [shape: f32[2,512], index: 3, kind: input, shape index: {}]   ;;  %s1687_s2 = inlined_call_operand.vmem [shape: f32[1,128], index: 2, kind: input, shape index: {}]   ;;  %s1688_s4 = inlined_call_operand.vmem [shape: bf16[128,128], index: 4, kind: input, shape index: {}]   ;;  %s1689_s5 = inlined_call_operand.vmem [shape: f32[1,128], index: 5, kind: input, shape index: {}]   ;;  %s1690_s6 = inlined_call_operand.vmem [shape: f32[2,128], index: 6, kind: output, shape index: {}]  }
   0x1   :  { %v1264_v0 = vld [vmem:[%s1684_s1 + $0x38] sm:$0xff]   ;;  %v1265_v1 = vld [vmem:[%s1684_s1 + $0x30] sm:$0xff]   ;;  %v1266_v2 = vld [vmem:[%s1684_s1 + $0x28] sm:$0xff]   ;;  %v708_v41 = vunpack.c.l.s4 %v1315_v40 }
   0x2   :  { %1161 = vmatprep.subr.bf16.mxu0 %v1264_v0  ;;  %v1267_v3 = vld [vmem:[%s1684_s1 + $0x20] sm:$0xff]   ;;  %v1268_v5 = vld [vmem:[%s1684_s1 + $0x18] sm:$0xff]   ;;  %v1269_v6 = vld [vmem:[%s1684_s1 + $0x10] sm:$0xff]   ;;  %v711_v44 = vshrl.u32 %v710_v42, 7 }
   0x3   :  { %1162 = vmatpush3.bf16.msra.mxu0 %v1264_v0  ;;  %v1272_v4 = vld [vmem:[%s1685_s0] sm:$0xff]   ;;  %v1270_v7 = vld [vmem:[%s1684_s1 + $0x8] sm:$0xff]   ;;  %v1274_v10 = vld [vmem:[%s1685_s0 + $0x10] sm:$0xff]   ;;  %v709_v43 = vunpack.c.0.s8 %v708_v41 }
   0x4   :  { %1163 = vmatprep.subr.bf16.mxu0 %v1265_v1  ;;  %1177 = vmatprep.mubr.bf16.mxu0 %v1272_v4  ;;  %v1271_v8 = vld [vmem:[%s1684_s1] sm:$0xff]   ;;  %v1273_v9 = vld [vmem:[%s1685_s0 + $0x8] sm:$0xff]   ;;  %v1275_v11 = vld [vmem:[%s1685_s0 + $0x18] sm:$0xff]  }
   0x5   :  { %v1276_v12 = vld [vmem:[%s1685_s0 + $0x20] sm:$0xff]   ;;  %v1277_v13 = vld [vmem:[%s1685_s0 + $0x28] sm:$0xff]   ;;  %v1278_v14 = vld [vmem:[%s1685_s0 + $0x30] sm:$0xff]   ;;  %v712_v45 = vsub.s32 %v709_v43, %v711_v44 }
   0x6   :  { %v1279_v15 = vld [vmem:[%s1685_s0 + $0x38] sm:$0xff]   ;;  %v1280_v16 = vld [vmem:[%s1685_s0 + $0x40] sm:$0xff]   ;;  %v1281_v17 = vld [vmem:[%s1685_s0 + $0x48] sm:$0xff]  }
   0x7   :  { %1164 = vmatpush3.bf16.msra.mxu0 %v1265_v1  ;;  %v1282_v18 = vld [vmem:[%s1685_s0 + $0x50] sm:$0xff]   ;;  %v1283_v19 = vld [vmem:[%s1685_s0 + $0x58] sm:$0xff]   ;;  %v1284_v20 = vld [vmem:[%s1685_s0 + $0x60] sm:$0xff]  }
   0x8   :  { %1165 = vmatprep.subr.bf16.mxu0 %v1266_v2  ;;  %v1285_v21 = vld [vmem:[%s1685_s0 + $0x68] sm:$0xff]   ;;  %v1286_v22 = vld [vmem:[%s1685_s0 + $0x70] sm:$0xff]   ;;  %v1287_v23 = vld [vmem:[%s1685_s0 + $0x78] sm:$0xff]  }
   0x9   :  { %v1288_v24 = vld [vmem:[%s1685_s0 + $0x80] sm:$0xff]   ;;  %v1289_v25 = vld [vmem:[%s1685_s0 + $0x88] sm:$0xff]   ;;  %v1290_v26 = vld [vmem:[%s1685_s0 + $0x90] sm:$0xff]  }
   0xa   :  { %v1291_v27 = vld [vmem:[%s1685_s0 + $0x98] sm:$0xff]   ;;  %v1292_v28 = vld [vmem:[%s1685_s0 + $0xa0] sm:$0xff]   ;;  %v1293_v29 = vld [vmem:[%s1685_s0 + $0xa8] sm:$0xff]  }
   0xb   :  { %1166 = vmatpush3.bf16.msra.mxu0 %v1266_v2  ;;  %v1294_v30 = vld [vmem:[%s1685_s0 + $0xb0] sm:$0xff]   ;;  %v1295_v31 = vld [vmem:[%s1685_s0 + $0xb8] sm:$0xff]   ;;  %v1296_v32 = vld [vmem:[%s1685_s0 + $0xc0] sm:$0xff]  }
   0xc   :  { %1167 = vmatprep.subr.bf16.mxu0 %v1267_v3  ;;  %v1297_v33 = vld [vmem:[%s1685_s0 + $0xc8] sm:$0xff]   ;;  %v1298_v34 = vld [vmem:[%s1685_s0 + $0xd0] sm:$0xff]   ;;  %v1299_v35 = vld [vmem:[%s1685_s0 + $0xd8] sm:$0xff]  }
   0xd   :  { %v1300_v36 = vld [vmem:[%s1685_s0 + $0xe0] sm:$0xff]   ;;  %v1301_v37 = vld [vmem:[%s1685_s0 + $0xe8] sm:$0xff]   ;;  %v1302_v38 = vld [vmem:[%s1685_s0 + $0xf0] sm:$0xff]  }
   0xe   :  { %v1303_v39 = vld [vmem:[%s1685_s0 + $0xf8] sm:$0xff]   ;;  %v704_v46 = vld [vmem:[%s1686_s3] sm:$0xff] }
   0xf   :  { %1168 = vmatpush3.bf16.msra.mxu0 %v1267_v3  ;;  %v1476_v47 = vrot.slane %v704_v46, %v712_v45  ;;  %v706_v62 = vcombine.high %v704_v46, %v704_v46 }
  0x10   :  { %1169 = vmatprep.subr.bf16.mxu0 %v1268_v5 }
  0x11   :  { %v721_v48 = vcombine.high %v1476_v47, %v1476_v47  ;;  %v1498_v1 = vrot.slane %v706_v62, %v712_v45 }
  0x13   :  { %1170 = vmatpush3.bf16.msra.mxu0 %v1268_v5  ;;  %791 = vmatprep.mubr.f32.mxu1 %v721_v48 }
  0x14   :  { %1171 = vmatprep.subr.bf16.mxu0 %v1269_v6 }
  0x17   :  { %1172 = vmatpush3.bf16.msra.mxu0 %v1269_v6 }
  0x18   :  { %1173 = vmatprep.subr.bf16.mxu0 %v1270_v7 }
  0x1b   :  { %1174 = vmatpush3.bf16.msra.mxu0 %v1270_v7 }
  0x1c   :  { %1175 = vmatprep.subr.bf16.mxu0 %v1271_v8 }
  0x1f   :  { %1176 = vmatpush3.bf16.msra.mxu0 %v1271_v8 }
  0x22   :  { %1178 = vmatmul.mubr.bf16.vlgmr.msra.gmra.mxu0 %v1273_v9 }
  0x23   :  { %1181 = vmatprep.mubr.bf16.mxu0 %v1274_v10 }
  0x2a   :  { %1182 = vmatmul.mubr.bf16.gmra.mxu0 %v1275_v11 }
  0x2b   :  { %1185 = vmatprep.mubr.bf16.mxu0 %v1276_v12 }
  0x32   :  { %1186 = vmatmul.mubr.bf16.gmra.mxu0 %v1277_v13 }
  0x33   :  { %1189 = vmatprep.mubr.bf16.mxu0 %v1278_v14 }
  0x3a   :  { %1190 = vmatmul.mubr.bf16.gmra.mxu0 %v1279_v15 }
  0x3b   :  { %1193 = vmatprep.mubr.bf16.mxu0 %v1280_v16 }
  0x42   :  { %1194 = vmatmul.mubr.bf16.gmra.mxu0 %v1281_v17  ;;  %v1517_v17 = vld [vmem:[%s1687_s2] ss:$0 sm:$0xff] }
  0x43   :  { %1197 = vmatprep.mubr.bf16.mxu0 %v1282_v18 }
  0x4a   :  { %1198 = vmatmul.mubr.bf16.gmra.mxu0 %v1283_v19 }
  0x4b   :  { %1201 = vmatprep.mubr.bf16.mxu0 %v1284_v20 }
  0x52   :  { %1202 = vmatmul.mubr.bf16.gmra.mxu0 %v1285_v21 }
  0x53   :  { %1205 = vmatprep.mubr.bf16.mxu0 %v1286_v22 }
  0x5a   :  { %1206 = vmatmul.mubr.bf16.gmra.mxu0 %v1287_v23 }
  0x5b   :  { %1209 = vmatprep.mubr.bf16.mxu0 %v1288_v24 }
  0x62   :  { %1210 = vmatmul.mubr.bf16.gmra.mxu0 %v1289_v25 }
  0x63   :  { %1213 = vmatprep.mubr.bf16.mxu0 %v1290_v26 }
  0x6a   :  { %1214 = vmatmul.mubr.bf16.gmra.mxu0 %v1291_v27 }
  0x6b   :  { %1217 = vmatprep.mubr.bf16.mxu0 %v1292_v28 }
  0x72   :  { %1218 = vmatmul.mubr.bf16.gmra.mxu0 %v1293_v29 }
  0x73   :  { %1221 = vmatprep.mubr.bf16.mxu0 %v1294_v30 }
  0x7a   :  { %1222 = vmatmul.mubr.bf16.gmra.mxu0 %v1295_v31 }
  0x7b   :  { %1225 = vmatprep.mubr.bf16.mxu0 %v1296_v32 }
  0x82   :  { %1226 = vmatmul.mubr.bf16.gmra.mxu0 %v1297_v33 }
  0x83   :  { %1229 = vmatprep.mubr.bf16.mxu0 %v1298_v34 }
  0x8a   :  { %1230 = vmatmul.mubr.bf16.gmra.mxu0 %v1299_v35 }
  0x8b   :  { %1233 = vmatprep.mubr.bf16.mxu0 %v1300_v36 }
  0x92   :  { %1234 = vmatmul.mubr.bf16.gmra.mxu0 %v1301_v37 }
  0x93   :  { %1237 = vmatprep.mubr.bf16.mxu0 %v1302_v38 }
  0x9a   :  { %1238 = vmatmul.mubr.bf16.gmra.mxu0 %v1303_v39 }
  0xe2   :  { %v1480_v49 = vpop.f32.mrf.mxu0 }
  0xe4   :  { %v1482_v50 = vpop.f32.mrf.mxu0 }
  0xe6   :  { %v1484_v51 = vpop.f32.mrf.mxu0 }
  0xe8   :  { %v1486_v52 = vpop.f32.mrf.mxu0 }
  0xea   :  { %v1488_v53 = vpop.f32.mrf.mxu0 }
  0xec   :  { %v1490_v54 = vpop.f32.mrf.mxu0 }
  0xee   :  { %v1492_v55 = vpop.f32.mrf.mxu0 }
  0xf0   :  { %v1494_v56 = vpop.f32.mrf.mxu0 }
  0xf2   :  { %v1187_v57 = vpop.f32.mrf.mxu0 }
  0xf3   :  { %v426_v41 = vadd.f32 %v1187_v57, %v1517_v17 }
  0xf4   :  { %v1496_v58 = vpop.f32.mrf.mxu0 }
  0xf5   :  { %v418_v57 = vadd.f32 %v1517_v17, %v1496_v58  ;;  %v410_v58 = vadd.f32 %v1488_v53, %v1517_v17 }
  0xf6   :  { %v1188_v59 = vpop.f32.mrf.mxu0 }
  0xf7   :  { %v429_v36 = vadd.f32 %v1188_v59, %v1517_v17 }
  0xf8   :  { %v420_v60 = vpop.f32.mrf.mxu0 }
  0xf9   :  { %v651_v46 = vmax.f32 %v429_v36, 0.0  ;;  %v421_v48 = vadd.f32 %v1517_v17, %v420_v60  ;;  %v413_v60 = vadd.f32 %v1492_v55, %v1517_v17 }
  0xfa   :  { %v1191_v61 = vpop.f32.mrf.mxu0 }
  0xfb   :  { %v442_v22 = vadd.f32 %v1191_v61, %v1517_v17 }
  0xfc   :  { %v433_v63 = vpop.f32.mrf.mxu0 }
  0xfd   :  { %v654_v31 = vmax.f32 %v442_v22, 0.0  ;;  %v434_v32 = vadd.f32 %v1517_v17, %v433_v63  ;;  %v650_v63 = vmax.f32 %v426_v41, 0.0  ;;  %v646_v22 = vmax.f32 %v410_v58, 0.0 }
  0xfe   :  { %v1192_v0 = vpop.f32.mrf.mxu0 }
  0xff   :  { %v445_v18 = vadd.f32 %v1192_v0, %v1517_v17  ;;  %v652_v42 = vmax.f32 %v434_v32, 0.0 }
 0x100   :  { %v436_v2 = vpop.f32.mrf.mxu0 }
 0x101   :  { %v655_v26 = vmax.f32 %v445_v18, 0.0  ;;  %v437_v27 = vadd.f32 %v1517_v17, %v436_v2 }
 0x102   :  { %v1500_v3 = vpop.f32.mrf.mxu0 }
 0x103   :  { %v653_v37 = vmax.f32 %v437_v27, 0.0 }
 0x104   :  { %v1502_v4 = vpop.f32.mrf.mxu0 }
 0x105   :  { %v450_v36 = vadd.f32 %v1517_v17, %v1502_v4  ;;  %v722_v4 = vcombine.high %v1498_v1, %v1498_v1 }
 0x106   :  { %v1504_v5 = vpop.f32.mrf.mxu0 }
 0x108   :  { %v1506_v6 = vpop.f32.mrf.mxu0 }
 0x10a   :  { %v1508_v7 = vpop.f32.mrf.mxu0 }
 0x10c   :  { %v1510_v8 = vpop.f32.mrf.mxu0 }
 0x10d   :  { %v466_v53 = vadd.f32 %v1517_v17, %v1510_v8  ;;  %v458_v8 = vadd.f32 %v1500_v3, %v1517_v17 }
 0x10e   :  { %v1200_v9 = vpop.f32.mrf.mxu0 }
 0x10f   :  { %v477_v2 = vadd.f32 %v1200_v9, %v1517_v17  ;;  %v658_v3 = vmax.f32 %v458_v8, 0.0 }
 0x110   :  { %v1512_v10 = vpop.f32.mrf.mxu0 }
 0x111   :  { %v663_v9 = vmax.f32 %v477_v2, 0.0  ;;  %v469_v55 = vadd.f32 %v1517_v17, %v1512_v10  ;;  %v461_v10 = vadd.f32 %v1504_v5, %v1517_v17 }
 0x112   :  { %v1203_v11 = vpop.f32.mrf.mxu0 }
 0x113   :  { %v490_v39 = vadd.f32 %v1203_v11, %v1517_v17  ;;  %v659_v5 = vmax.f32 %v461_v10, 0.0 }
 0x114   :  { %v481_v12 = vpop.f32.mrf.mxu0 }
 0x115   :  { %v666_v61 = vmax.f32 %v490_v39, 0.0  ;;  %v482_v62 = vadd.f32 %v1517_v17, %v481_v12  ;;  %v474_v12 = vadd.f32 %v1508_v7, %v1517_v17 }
 0x116   :  { %v1204_v13 = vpop.f32.mrf.mxu0 }
 0x117   :  { %v493_v34 = vadd.f32 %v1204_v13, %v1517_v17  ;;  %v649_v13 = vmax.f32 %v421_v48, 0.0  ;;  %v662_v7 = vmax.f32 %v474_v12, 0.0 }
 0x118   :  { %v484_v14 = vpop.f32.mrf.mxu0 }
 0x119   :  { %v667_v44 = vmax.f32 %v493_v34, 0.0  ;;  %v485_v45 = vadd.f32 %v1517_v17, %v484_v14  ;;  %v389_v34 = vadd.f32 %v1517_v17, %v1486_v52 }
 0x11a   :  { %v1207_v15 = vpop.f32.mrf.mxu0 }
 0x11b   :  { %v506_v20 = vadd.f32 %v1207_v15, %v1517_v17  ;;  %v665_v11 = vmax.f32 %v485_v45, 0.0  ;;  %v664_v15 = vmax.f32 %v482_v62, 0.0 }
 0x11c   :  { %v497_v16 = vpop.f32.mrf.mxu0 }
 0x11d   :  { %v670_v29 = vmax.f32 %v506_v20, 0.0  ;;  %v498_v30 = vadd.f32 %v1517_v17, %v497_v16  ;;  %v648_v16 = vmax.f32 %v418_v57, 0.0  ;;  %v405_v20 = vadd.f32 %v1517_v17, %v1494_v56 }
 0x11e   :  { %v1208_v19 = vpop.f32.mrf.mxu0  ;;  %v397_v56 = vadd.f32 %v1484_v51, %v1517_v17  ;;  %v453_v51 = vadd.f32 %v1517_v17, %v1506_v6  ;;  %v641_v6 = vmax.f32 %v389_v34, 0.0 }
 0x11f   :  { %v509_v21 = vadd.f32 %v1208_v19, %v1517_v17  ;;  %v668_v40 = vmax.f32 %v498_v30, 0.0  ;;  %v647_v19 = vmax.f32 %v413_v60, 0.0 }
 0x120   :  { %v500_v23 = vpop.f32.mrf.mxu0  ;;  %v643_v32 = vmax.f32 %v397_v56, 0.0 }
 0x121   :  { %v501_v24 = vadd.f32 %v1517_v17, %v500_v23  ;;  %v671_v25 = vmax.f32 %v509_v21, 0.0  ;;  %v402_v23 = vadd.f32 %v1517_v17, %v1490_v54  ;;  %v394_v54 = vadd.f32 %v1480_v49, %v1517_v17 }
 0x122   :  { %v1525_v28 = vpop.f32.mrf.mxu0 }
 0x123   :  { %1082 = vmatprep.subr.mxu1 %v671_v25  ;;  %v669_v35 = vmax.f32 %v501_v24, 0.0  ;;  %v661_v25 = vmax.f32 %v469_v55, 0.0  ;;  %v644_v30 = vmax.f32 %v402_v23, 0.0  ;;  %v642_v49 = vmax.f32 %v394_v54, 0.0 }
 0x124   :  { %v1529_v33 = vpop.f32.mrf.mxu0  ;;  %1083 = vmatpush3.msra.mxu1 %v655_v26  ;;  %v645_v26 = vmax.f32 %v405_v20, 0.0 }
 0x125   :  { %1084 = vmatprep.subr.mxu1 %v670_v29  ;;  %v660_v29 = vmax.f32 %v466_v53, 0.0 }
 0x126   :  { %v1533_v38 = vpop.f32.mrf.mxu0  ;;  %1085 = vmatpush3.msra.mxu1 %v654_v31 }
 0x127   :  { %1086 = vmatprep.subr.mxu1 %v669_v35 }
 0x128   :  { %v1537_v43 = vpop.f32.mrf.mxu0  ;;  %1087 = vmatpush3.msra.mxu1 %v653_v37  ;;  %v386_v37 = vadd.f32 %v1517_v17, %v1482_v50 }
 0x129   :  { %1088 = vmatprep.subr.mxu1 %v668_v40  ;;  %v657_v40 = vmax.f32 %v453_v51, 0.0 }
 0x12a   :  { %v1541_v59 = vpop.f32.mrf.mxu0  ;;  %1089 = vmatpush3.msra.mxu1 %v652_v42  ;;  %v656_v42 = vmax.f32 %v450_v36, 0.0  ;;  %v640_v52 = vmax.f32 %v386_v37, 0.0 }
 0x12b   :  { %1090 = vmatprep.subr.mxu1 %v667_v44 }
 0x12c   :  { %v1546_v0 = vpop.f32.mrf.mxu0  ;;  %1091 = vmatpush3.msra.mxu1 %v651_v46 }
 0x12d   :  { %1092 = vmatprep.subr.mxu1 %v666_v61 }
 0x12e   :  { %v1551_v14 = vpop.f32.mrf.mxu0  ;;  %1093 = vmatpush3.msra.mxu1 %v650_v63 }
 0x12f   :  { %1094 = vmatprep.subr.mxu1 %v665_v11 }
 0x130   :  { %v1557_v18 = vpop.f32.mrf.mxu0  ;;  %1095 = vmatpush3.msra.mxu1 %v649_v13 }
 0x131   :  { %1096 = vmatprep.subr.mxu1 %v664_v15 }
 0x132   :  { %v1563_v21 = vpop.f32.mrf.mxu0  ;;  %1097 = vmatpush3.msra.mxu1 %v648_v16 }
 0x133   :  { %1098 = vmatprep.subr.mxu1 %v663_v9  ;;  %v554_v51 = vadd.f32 %v1563_v21, %v1517_v17 }
 0x134   :  { %v1569_v24 = vpop.f32.mrf.mxu0  ;;  %1099 = vmatpush3.msra.mxu1 %v647_v19 }
 0x135   :  { %1100 = vmatprep.subr.mxu1 %v662_v7  ;;  %v682_v37 = vmax.f32 %v554_v51, 0.0 }
 0x136   :  { %v1575_v27 = vpop.f32.mrf.mxu0  ;;  %1101 = vmatpush3.msra.mxu1 %v646_v22 }
 0x137   :  { %1102 = vmatprep.subr.mxu1 %v661_v25 }
 0x138   :  { %v1581_v31 = vpop.f32.mrf.mxu0  ;;  %1103 = vmatpush3.msra.mxu1 %v645_v26 }
 0x139   :  { %1104 = vmatprep.subr.mxu1 %v660_v29  ;;  %v557_v29 = vadd.f32 %v1575_v27, %v1517_v17  ;;  %v549_v36 = vadd.f32 %v1517_v17, %v1581_v31 }
 0x13a   :  { %v1223_v35 = vpop.f32.mrf.mxu0  ;;  %1105 = vmatpush3.msra.mxu1 %v644_v30 }
 0x13b   :  { %1106 = vmatprep.subr.mxu1 %v659_v5  ;;  %v570_v55 = vadd.f32 %v1223_v35, %v1517_v17 }
 0x13c   :  { %v561_v39 = vpop.f32.mrf.mxu0  ;;  %1107 = vmatpush3.msra.mxu1 %v643_v32 }
 0x13d   :  { %1108 = vmatprep.subr.mxu1 %v658_v3  ;;  %v686_v25 = vmax.f32 %v570_v55, 0.0  ;;  %v562_v56 = vadd.f32 %v1517_v17, %v561_v39  ;;  %v683_v3 = vmax.f32 %v557_v29, 0.0  ;;  %v546_v39 = vadd.f32 %v1517_v17, %v1569_v24 }
 0x13e   :  { %v1224_v41 = vpop.f32.mrf.mxu0  ;;  %1109 = vmatpush3.msra.mxu1 %v642_v49 }
 0x13f   :  { %1110 = vmatprep.subr.mxu1 %v657_v40  ;;  %v684_v32 = vmax.f32 %v562_v56, 0.0 }
 0x140   :  { %v564_v44 = vpop.f32.mrf.mxu0  ;;  %1111 = vmatpush3.msra.mxu1 %v641_v6  ;;  %v541_v6 = vadd.f32 %v1551_v14, %v1517_v17 }
 0x141   :  { %1112 = vmatprep.subr.mxu1 %v656_v42  ;;  %v565_v22 = vadd.f32 %v1517_v17, %v564_v44  ;;  %v680_v44 = vmax.f32 %v546_v39, 0.0 }
 0x142   :  { %v1593_v45 = vpop.f32.mrf.mxu0  ;;  %1113 = vmatpush3.msra.mxu1 %v640_v52  ;;  %v538_v52 = vadd.f32 %v1541_v59, %v1517_v17  ;;  %v530_v59 = vadd.f32 %v1517_v17, %v1546_v0 }
 0x143   :  { %792 = vmatmul.mubr.f32.vlgmr.msra.gmra.mxu1 %v1476_v47  ;;  %v573_v47 = vadd.f32 %v1224_v41, %v1517_v17  ;;  %v685_v54 = vmax.f32 %v565_v22, 0.0  ;;  %v681_v41 = vmax.f32 %v549_v36, 0.0  ;;  %v1311_v22 = vld [vmem:[%s1688_s4 + $0x8] sm:$0xff]  }
 0x144   :  { %v1596_v50 = vpop.f32.mrf.mxu0  ;;  %861 = vmatprep.mubr.f32.mxu1 %v722_v4  ;;  %v676_v0 = vmax.f32 %v530_v59, 0.0 }
 0x145   :  { %v687_v53 = vmax.f32 %v573_v47, 0.0 }
 0x146   :  { %v1598_v46 = vpop.f32.mrf.mxu0 }
 0x148   :  { %v1600_v48 = vpop.f32.mrf.mxu0 }
 0x14a   :  { %v1231_v61 = vpop.f32.mrf.mxu0 }
 0x14b   :  { %v602_v31 = vadd.f32 %v1231_v61, %v1517_v17 }
 0x14c   :  { %v1602_v62 = vpop.f32.mrf.mxu0 }
 0x14d   :  { %v694_v14 = vmax.f32 %v602_v31, 0.0  ;;  %v594_v61 = vadd.f32 %v1517_v17, %v1602_v62 }
 0x14e   :  { %v1232_v63 = vpop.f32.mrf.mxu0 }
 0x14f   :  { %v605_v21 = vadd.f32 %v1232_v63, %v1517_v17  ;;  %v679_v63 = vmax.f32 %v541_v6, 0.0  ;;  %v692_v62 = vmax.f32 %v594_v61, 0.0 }
 0x150   :  { %v596_v57 = vpop.f32.mrf.mxu0 }
 0x151   :  { %v695_v24 = vmax.f32 %v605_v21, 0.0  ;;  %v597_v4 = vadd.f32 %v1517_v17, %v596_v57 }
 0x152   :  { %v1235_v2 = vpop.f32.mrf.mxu0 }
 0x153   :  { %v618_v30 = vadd.f32 %v1235_v2, %v1517_v17  ;;  %v533_v2 = vadd.f32 %v1517_v17, %v1557_v18  ;;  %v693_v57 = vmax.f32 %v597_v4, 0.0 }
 0x154   :  { %v609_v11 = vpop.f32.mrf.mxu0 }
 0x155   :  { %v698_v27 = vmax.f32 %v618_v30, 0.0  ;;  %v610_v49 = vadd.f32 %v1517_v17, %v609_v11  ;;  %v678_v11 = vmax.f32 %v538_v52, 0.0  ;;  %v677_v18 = vmax.f32 %v533_v2, 0.0 }
 0x156   :  { %v1236_v60 = vpop.f32.mrf.mxu0 }
 0x157   :  { %v621_v26 = vadd.f32 %v1236_v60, %v1517_v17  ;;  %v696_v42 = vmax.f32 %v610_v49, 0.0  ;;  %v589_v60 = vadd.f32 %v1598_v46, %v1517_v17  ;;  %v581_v46 = vadd.f32 %v1517_v17, %v1600_v48 }
 0x158   :  { %v612_v13 = vpop.f32.mrf.mxu0 }
 0x159   :  { %v699_v34 = vmax.f32 %v621_v26, 0.0  ;;  %v613_v35 = vadd.f32 %v1517_v17, %v612_v13  ;;  %v525_v13 = vadd.f32 %v1533_v38, %v1517_v17  ;;  %v691_v47 = vmax.f32 %v589_v60, 0.0 }
 0x15a   :  { %v1239_v12 = vpop.f32.mrf.mxu0  ;;  %v517_v38 = vadd.f32 %v1517_v17, %v1537_v43  ;;  %v689_v55 = vmax.f32 %v581_v46, 0.0  ;;  %v1316_v43 = vmov 0.0  }
 0x15b   :  { %v634_v16 = vadd.f32 %v1239_v12, %v1517_v17  ;;  %v697_v40 = vmax.f32 %v613_v35, 0.0  ;;  %v586_v12 = vadd.f32 %v1593_v45, %v1517_v17  ;;  %v578_v45 = vadd.f32 %v1517_v17, %v1596_v50  ;;  %v1305_v50 = vld [vmem:[%s1688_s4 + $0x38] sm:$0xff]  }
 0x15c   :  { %v625_v15 = vpop.f32.mrf.mxu0 }
 0x15d   :  { %v702_v23 = vmax.f32 %v634_v16, 0.0  ;;  %v626_v10 = vadd.f32 %v1517_v17, %v625_v15  ;;  %v522_v15 = vadd.f32 %v1525_v28, %v1517_v17  ;;  %v690_v16 = vmax.f32 %v586_v12, 0.0 }
 0x15e   :  { %v1240_v58 = vpop.f32.mrf.mxu0  ;;  %v514_v28 = vadd.f32 %v1517_v17, %v1529_v33  ;;  %v688_v48 = vmax.f32 %v578_v45, 0.0  ;;  %v1307_v33 = vld [vmem:[%s1688_s4 + $0x28] sm:$0xff]  }
 0x15f   :  { %v637_v9 = vadd.f32 %v1240_v58, %v1517_v17  ;;  %v700_v5 = vmax.f32 %v626_v10, 0.0  ;;  %v675_v58 = vmax.f32 %v525_v13, 0.0 }
 0x160   :  { %v628_v19 = vpop.f32.mrf.mxu0 }
 0x161   :  { %v703_v20 = vmax.f32 %v637_v9, 0.0  ;;  %v629_v7 = vadd.f32 %v1517_v17, %v628_v19  ;;  %v674_v9 = vmax.f32 %v522_v15, 0.0  ;;  %v673_v19 = vmax.f32 %v517_v38, 0.0  ;;  %v1306_v17 = vld [vmem:[%s1688_s4 + $0x30] sm:$0xff]  }
 0x163   :  { %1117 = vmatprep.subr.mxu1 %v703_v20  ;;  %v701_v8 = vmax.f32 %v629_v7, 0.0  ;;  %v672_v20 = vmax.f32 %v514_v28, 0.0  ;;  %v1309_v7 = vld [vmem:[%s1688_s4 + $0x18] sm:$0xff]  }
 0x164   :  { %1118 = vmatpush3.msra.mxu1 %v687_v53  ;;  %v1310_v53 = vld [vmem:[%s1688_s4 + $0x10] sm:$0xff]  }
 0x165   :  { %1119 = vmatprep.subr.mxu1 %v702_v23  ;;  %v1312_v23 = vld [vmem:[%s1688_s4] sm:$0xff]  }
 0x166   :  { %1120 = vmatpush3.msra.mxu1 %v686_v25 }
 0x167   :  { %1121 = vmatprep.subr.mxu1 %v701_v8 }
 0x168   :  { %1122 = vmatpush3.msra.mxu1 %v685_v54 }
 0x169   :  { %1123 = vmatprep.subr.mxu1 %v700_v5  ;;  %v1033_v5 = vld [vmem:[%s1689_s5] ss:$0 sm:$0xff] }
 0x16a   :  { %1124 = vmatpush3.msra.mxu1 %v684_v32 }
 0x16b   :  { %1125 = vmatprep.subr.mxu1 %v699_v34 }
 0x16c   :  { %1126 = vmatpush3.msra.mxu1 %v683_v3 }
 0x16d   :  { %1127 = vmatprep.subr.mxu1 %v698_v27 }
 0x16e   :  { %1128 = vmatpush3.msra.mxu1 %v682_v37 }
 0x16f   :  { %1129 = vmatprep.subr.mxu1 %v697_v40 }
 0x170   :  { %1130 = vmatpush3.msra.mxu1 %v681_v41 }
 0x171   :  { %1131 = vmatprep.subr.mxu1 %v696_v42 }
 0x172   :  { %1132 = vmatpush3.msra.mxu1 %v680_v44 }
 0x173   :  { %1133 = vmatprep.subr.mxu1 %v695_v24 }
 0x174   :  { %1134 = vmatpush3.msra.mxu1 %v679_v63 }
 0x175   :  { %1135 = vmatprep.subr.mxu1 %v694_v14 }
 0x176   :  { %1136 = vmatpush3.msra.mxu1 %v678_v11 }
 0x177   :  { %1137 = vmatprep.subr.mxu1 %v693_v57 }
 0x178   :  { %1138 = vmatpush3.msra.mxu1 %v677_v18 }
 0x179   :  { %1139 = vmatprep.subr.mxu1 %v692_v62 }
 0x17a   :  { %1140 = vmatpush3.msra.mxu1 %v676_v0 }
 0x17b   :  { %1141 = vmatprep.subr.mxu1 %v691_v47 }
 0x17c   :  { %1142 = vmatpush3.msra.mxu1 %v675_v58 }
 0x17d   :  { %1143 = vmatprep.subr.mxu1 %v690_v16 }
 0x17e   :  { %1144 = vmatpush3.msra.mxu1 %v674_v9 }
 0x17f   :  { %1145 = vmatprep.subr.mxu1 %v689_v55 }
 0x180   :  { %1146 = vmatpush3.msra.mxu1 %v673_v19 }
 0x181   :  { %1147 = vmatprep.subr.mxu1 %v688_v48 }
 0x182   :  { %1148 = vmatpush3.msra.mxu1 %v672_v20 }
 0x183   :  { %862 = vmatmul.mubr.f32.vlgmr.msra.gmra.mxu1 %v1498_v1  ;;  %1241 = vmatprep.subr.bf16.mxu1 %v1316_v43  ;;  %v1308_v1 = vld [vmem:[%s1688_s4 + $0x20] sm:$0xff]  }
 0x184   :  { %1242 = vmatpush3.bf16.msra.mxu1 %v1305_v50  ;;  %1257 = vmatprep.mubr.msk.bf16.mxu1 %vm1317_vm0, %v1316_v43 }
 0x185   :  { %1243 = vmatprep.subr.bf16.mxu1 %v1316_v43 }
 0x188   :  { %1244 = vmatpush3.bf16.msra.mxu1 %v1306_v17 }
 0x189   :  { %1245 = vmatprep.subr.bf16.mxu1 %v1316_v43 }
 0x18c   :  { %1246 = vmatpush3.bf16.msra.mxu1 %v1307_v33 }
 0x18d   :  { %1247 = vmatprep.subr.bf16.mxu1 %v1316_v43 }
 0x190   :  { %1248 = vmatpush3.bf16.msra.mxu1 %v1308_v1 }
 0x191   :  { %1249 = vmatprep.subr.bf16.mxu1 %v1316_v43 }
 0x194   :  { %1250 = vmatpush3.bf16.msra.mxu1 %v1309_v7 }
 0x195   :  { %1251 = vmatprep.subr.bf16.mxu1 %v1316_v43 }
 0x198   :  { %1252 = vmatpush3.bf16.msra.mxu1 %v1310_v53 }
 0x199   :  { %1253 = vmatprep.subr.bf16.mxu1 %v1316_v43 }
 0x19c   :  { %1254 = vmatpush3.bf16.msra.mxu1 %v1311_v22 }
 0x19d   :  { %1255 = vmatprep.subr.bf16.mxu1 %v1316_v43 }
 0x1a0   :  { %1256 = vmatpush3.bf16.msra.mxu1 %v1312_v23 }
 0x203   :  { %v1114_v10 = vpop.f32.mrf.mxu1 }
 0x205   :  { %v1115_v25 = vpop.f32.mrf.mxu1 }
 0x206   :  { %v1116_v8 = vadd.f32 %v1115_v25, %v1114_v10 }
 0x243   :  { %v1149_v56 = vpop.f32.mrf.mxu1 }
 0x245   :  { %v1150_v26 = vpop.f32.mrf.mxu1 }
 0x246   :  { %v1151_v29 = vadd.f32 %v1150_v26, %v1149_v56 }
 0x248   :  { %v864_v54 = vadd.f32 %v1151_v29, %v1116_v8 }
 0x24a   :  { %v867_v30 = vpack.c.bf16 %v864_v54, %v864_v54 }
 0x24c   :  { %1258 = vmatmul.mubr.bf16.vlgmr.msra.gmra.mxu1 %v867_v30 }
 0x30c   :  { %v973_v51 = vpop.f32.mrf.mxu1 }
 0x30d   :  { %v974_v32 = vadd.f32 %v1033_v5, %v973_v51 }
 0x30e   :  { %v1259_v34 = vpop.f32.mrf.mxu1 }
 0x30f   :  { %v979_v35 = vmul.f32 %v974_v32, %v974_v32 }
 0x310   :  { %v976_v3 = vpop.f32.mrf.mxu1 }
 0x311   :  { %v981_v36 = vsel %vm980_vm1, %v979_v35, 0.0 }
 0x312   :  { %v1260_v27 = vpop.f32.mrf.mxu1  ;;  %982 = vadd.xlane.f32.xlu0 %v981_v36 }
 0x39b   :  { %v983_v49 = vpop.xlane.xlu0 %982 }
 0x39c   :  { %v984_v37 = vmax.f32 %v983_v49, 1e-24 }
 0x39e   :  { %1313 = vrsqrt.f32 %v984_v37 }
 0x3ab   :  { %v1314_v39 = vpop.eup %1313 }
 0x3ac   :  { %v986_v21 = vmul.f32 %v1314_v39, %v974_v32 }
 0x3ae   :  { %987 = vst [vmem:[%s1690_s6] sm:$0x3] %v986_v21 }

</bundles_post_ra>
